<compile_context>
chip_gen: v7x
topology: tpu7x:2x2x1
jax: 0.10.0
libtpu: 0.0.40
codegen_flags: <defaults>
</compile_context>

<pallas_src>
import functools

import jax
import jax.numpy as jnp
from jax.experimental import pallas as pl
from jax.experimental.pallas import tpu as pltpu


# ----------------------------- fused per-layer kernel -----------------------------

def _bilstm_layer_kernel(*refs, t_chunk, batch, hidden, with_fc):
    """One bidirectional LSTM layer (both directions fused), optional FC epilogue.

    Inputs (refs, in order):
      x_f_ref : (Tc*B, F)  time-major rows, time block t            (forward view)
      x_b_ref : (Tc*B, F)  time-major rows, time block nT-1-t       (backward view)
      w_ih_ref: (2, F, 4H) input weights, gate cols [i, f, o, g]
      b_ref   : (2, 1, 4H) b_ih + b_hh, gate cols [i, f, o, g]      (f32)
      w_hh_ref: (2, H, 4H) recurrent weights, gate cols [i, f, o, g]
      [w_fc_ref: (2H, C), b_fc_ref: (1, C)]                          (only if with_fc)
    Outputs:
      out_f_ref: (Tc*B, H) forward hidden states, time block t
      out_b_ref: (Tc*B, H) backward hidden states, time block nT-1-t
      [fc_ref  : (B, C)]                                             (only if with_fc)
    Scratch (persist across grid steps):
      h_f_sc, h_b_sc, c_f_sc, c_b_sc: (B, H) f32 carries
      [last_sc: (B, 2H) f32 — concat(h_fwd(T-1), h_bwd(T-1))]        (only if with_fc)
    """
    if with_fc:
        (x_f_ref, x_b_ref, w_ih_ref, b_ref, w_hh_ref, w_fc_ref, b_fc_ref,
         out_f_ref, out_b_ref, fc_ref,
         h_f_sc, h_b_sc, c_f_sc, c_b_sc, last_sc) = refs
    else:
        (x_f_ref, x_b_ref, w_ih_ref, b_ref, w_hh_ref,
         out_f_ref, out_b_ref,
         h_f_sc, h_b_sc, c_f_sc, c_b_sc) = refs

    Tc, B, H = t_chunk, batch, hidden
    t = pl.program_id(0)
    nT = pl.num_programs(0)

    @pl.when(t == 0)
    def _init():
        h_f_sc[...] = jnp.zeros(h_f_sc.shape, h_f_sc.dtype)
        h_b_sc[...] = jnp.zeros(h_b_sc.shape, h_b_sc.dtype)
        c_f_sc[...] = jnp.zeros(c_f_sc.shape, c_f_sc.dtype)
        c_b_sc[...] = jnp.zeros(c_b_sc.shape, c_b_sc.dtype)

    # ---- chunk preamble: hoisted input projections for both directions (chunk-level MXU) ----
    w_ih_f = w_ih_ref[0]                      # (F, 4H)
    w_ih_b = w_ih_ref[1]
    xf = x_f_ref[...].astype(w_ih_f.dtype)    # (Tc*B, F)
    xb = x_b_ref[...].astype(w_ih_b.dtype)
    gin_f = jnp.dot(xf, w_ih_f, preferred_element_type=jnp.float32) + b_ref[0]   # (Tc*B, 4H) f32
    gin_b = jnp.dot(xb, w_ih_b, preferred_element_type=jnp.float32) + b_ref[1]

    w_hh_f = w_hh_ref[0]                      # (H, 4H), resident
    w_hh_b = w_hh_ref[1]

    h_f = h_f_sc[...]
    h_b = h_b_sc[...]
    c_f = c_f_sc[...]
    c_b = c_b_sc[...]

    # ---- serial recurrence over the chunk: fully unrolled, all addressing static ----
    for i in range(Tc):
        j = Tc - 1 - i                        # backward chain's local index in its chunk
        # Two independent small matmuls issued back-to-back (overlap in the MXU pipeline).
        g_f = gin_f[i * B:(i + 1) * B, :] + jnp.dot(
            h_f.astype(w_hh_f.dtype), w_hh_f, preferred_element_type=jnp.float32)
        g_b = gin_b[j * B:(j + 1) * B, :] + jnp.dot(
            h_b.astype(w_hh_b.dtype), w_hh_b, preferred_element_type=jnp.float32)

        # Gate column order [i, f, o, g]: one sigmoid over 3H, one tanh over H per direction.
        s_f = jax.nn.sigmoid(g_f[:, :3 * H])
        tg_f = jnp.tanh(g_f[:, 3 * H:])
        s_b = jax.nn.sigmoid(g_b[:, :3 * H])
        tg_b = jnp.tanh(g_b[:, 3 * H:])

        c_f = s_f[:, H:2 * H] * c_f + s_f[:, :H] * tg_f
        c_b = s_b[:, H:2 * H] * c_b + s_b[:, :H] * tg_b
        h_f = s_f[:, 2 * H:3 * H] * jnp.tanh(c_f)
        h_b = s_b[:, 2 * H:3 * H] * jnp.tanh(c_b)

        out_f_ref[i * B:(i + 1) * B, :] = h_f
        out_b_ref[j * B:(j + 1) * B, :] = h_b

        if with_fc and i == 0:
            # The backward chain's very first step (grid step 0) is global time T-1.
            @pl.when(t == 0)
            def _stash_bwd_last():
                last_sc[:, H:] = h_b

        if with_fc and i == Tc - 1:
            # The forward chain's very last step (grid step nT-1) is global time T-1:
            # finish the FC head in the epilogue of the final grid step.
            @pl.when(t == nT - 1)
            def _fc_epilogue():
                last_sc[:, :H] = h_f
                fc_ref[...] = (jnp.dot(last_sc[...].astype(w_fc_ref.dtype), w_fc_ref[...],
                                       preferred_element_type=jnp.float32)
                               + b_fc_ref[...])

    h_f_sc[...] = h_f
    h_b_sc[...] = h_b
    c_f_sc[...] = c_f
    c_b_sc[...] = c_b


# ------------------------------- chunk-size heuristics -------------------------------

def _vmem_budget_bytes():
    cap = 128 << 20
    try:
        info = pltpu.get_tpu_info()
        cap = int(getattr(info, "vmem_capacity_bytes", cap))
    except Exception:
        pass
    # Leave generous headroom below both the scoped limit we request and physical VMEM
    # (v7x has only 64 MiB per TensorCore).
    return min(cap // 4, 16 << 20)


def _pick_t_chunk(T, B, F, H, requested=None):
    def ok(tc):
        return T % tc == 0 and (tc == T or (tc * B) % 8 == 0)

    if requested is not None and ok(requested):
        return requested

    budget = _vmem_budget_bytes()

    def est(tc):
        blk_in = 2 * 2 * tc * B * F * 4        # two x views, double-buffered
        blk_out = 2 * 2 * tc * B * H * 4       # two hidden outputs, double-buffered
        gin = 2 * tc * B * 4 * H * 4           # chunk gate-projection temporaries
        weights = (2 * F * 4 * H + 2 * H * 4 * H + 2 * 4 * H) * 4
        return blk_in + blk_out + gin + weights

    best = None
    fallback = None
    for tc in range(1, T + 1):
        if not ok(tc):
            continue
        if fallback is None:
            fallback = tc
        if est(tc) <= budget:
            best = tc
    if best is not None:
        return best
    return fallback if fallback is not None else T


# --------------------------------- per-layer wrapper ---------------------------------

def run_bilstm_layer(x_flat, layer_packed, *, T, B, fc=None, t_chunk=None):
    """x_flat: (T*B, F) time-major rows.  Returns (out_f, out_b[, fc_out])."""
    M, F = x_flat.shape
    assert M == T * B
    w_ih = layer_packed["w_ih"]        # (2, F, 4H)
    w_hh = layer_packed["w_hh"]        # (2, H, 4H)
    bias = layer_packed["bias"]        # (2, 1, 4H) f32
    H = w_hh.shape[1]
    G = 4 * H

    tc = _pick_t_chunk(T, B, F, H, requested=t_chunk)
    nT = T // tc
    with_fc = fc is not None

    kernel = functools.partial(_bilstm_layer_kernel,
                               t_chunk=tc, batch=B, hidden=H, with_fc=with_fc)

    in_specs = [
        pl.BlockSpec((tc * B, F), lambda t: (t, 0)),               # x, forward time order
        pl.BlockSpec((tc * B, F), lambda t: (nT - 1 - t, 0)),      # x, reverse time order
        pl.BlockSpec((2, F, G), lambda t: (0, 0, 0)),              # W_ih (resident)
        pl.BlockSpec((2, 1, G), lambda t: (0, 0, 0)),              # bias
        pl.BlockSpec((2, H, G), lambda t: (0, 0, 0)),              # W_hh (resident)
    ]
    inputs = [x_flat, x_flat, w_ih, bias, w_hh]

    out_shapes = [jax.ShapeDtypeStruct((M, H), jnp.float32),
                  jax.ShapeDtypeStruct((M, H), jnp.float32)]
    out_specs = [pl.BlockSpec((tc * B, H), lambda t: (t, 0)),
                 pl.BlockSpec((tc * B, H), lambda t: (nT - 1 - t, 0))]

    scratch = [pltpu.VMEM((B, H), jnp.float32),    # h fwd carry
               pltpu.VMEM((B, H), jnp.float32),    # h bwd carry
               pltpu.VMEM((B, H), jnp.float32),    # c fwd carry
               pltpu.VMEM((B, H), jnp.float32)]    # c bwd carry

    if with_fc:
        w_fc, b_fc = fc                            # (2H, C), (1, C)
        C = w_fc.shape[1]
        in_specs += [pl.BlockSpec((2 * H, C), lambda t: (0, 0)),
                     pl.BlockSpec((1, C), lambda t: (0, 0))]
        inputs += [w_fc, b_fc]
        out_shapes.append(jax.ShapeDtypeStruct((B, C), jnp.float32))
        out_specs.append(pl.BlockSpec((B, C), lambda t: (0, 0)))
        scratch.append(pltpu.VMEM((B, 2 * H), jnp.float32))   # concat(h_fwd(T-1), h_bwd(T-1))

    return pl.pallas_call(
        kernel,
        out_shape=tuple(out_shapes),
        grid_spec=pltpu.PrefetchScalarGridSpec(
            num_scalar_prefetch=0,
            grid=(nT,),                                        # time chunks, sequential
            in_specs=in_specs,
            out_specs=out_specs,
            scratch_shapes=scratch),
        compiler_params=pltpu.CompilerParams(
            dimension_semantics=("arbitrary",),
            vmem_limit_bytes=32 * 1024 * 1024),
    )(*inputs)


# ------------------------------ parameters & packing ---------------------------------

def init_bilstm_params(key, input_size, hidden_size, num_layers, num_classes):
    """Raw parameters with PyTorch nn.LSTM / nn.Linear shapes & gate order [i, f, g, o]."""
    H = hidden_size
    bound = float(H) ** -0.5
    layers = []
    for layer in range(num_layers):
        d_in = input_size if layer == 0 else 2 * H
        ldict = {}
        for dname in ("fwd", "bwd"):
            key, k1, k2, k3, k4 = jax.random.split(key, 5)
            ldict[dname] = {
                "w_ih": jax.random.uniform(k1, (4 * H, d_in), jnp.float32, -bound, bound),
                "w_hh": jax.random.uniform(k2, (4 * H, H), jnp.float32, -bound, bound),
                "b_ih": jax.random.uniform(k3, (4 * H,), jnp.float32, -bound, bound),
                "b_hh": jax.random.uniform(k4, (4 * H,), jnp.float32, -bound, bound),
            }
        layers.append(ldict)
    key, k1, k2 = jax.random.split(key, 3)
    fc_bound = float(2 * H) ** -0.5
    fc = {"weight": jax.random.uniform(k1, (num_classes, 2 * H), jnp.float32, -fc_bound, fc_bound),
          "bias": jax.random.uniform(k2, (num_classes,), jnp.float32, -fc_bound, fc_bound)}
    return {"layers": layers, "fc": fc}


def _permute_gates_ifog(w, h, axis=0):
    """Reorder PyTorch gate blocks [i, f, g, o] -> kernel order [i, f, o, g]."""
    parts = jnp.split(w, 4, axis=axis)
    return jnp.concatenate([parts[0], parts[1], parts[3], parts[2]], axis=axis)


def pack_params_for_pallas(params, mxu_dtype=jnp.float32):
    layers = []
    for layer in params["layers"]:
        H = layer["fwd"]["w_hh"].shape[1]
        w_ih_dirs, w_hh_dirs, bias_dirs = [], [], []
        for dname in ("fwd", "bwd"):
            p = layer[dname]
            w_ih_dirs.append(_permute_gates_ifog(p["w_ih"], H).T)                 # (F, 4H)
            w_hh_dirs.append(_permute_gates_ifog(p["w_hh"], H).T)                 # (H, 4H)
            bias_dirs.append(_permute_gates_ifog(p["b_ih"] + p["b_hh"], H).reshape(1, 4 * H))
        layers.append({
            "w_ih": jnp.stack(w_ih_dirs, 0).astype(mxu_dtype),    # (2, F, 4H)
            "w_hh": jnp.stack(w_hh_dirs, 0).astype(mxu_dtype),    # (2, H, 4H)
            "bias": jnp.stack(bias_dirs, 0).astype(jnp.float32),  # (2, 1, 4H) f32
        })
    fc = {"w_t": params["fc"]["weight"].T.astype(mxu_dtype),      # (2H, C)
          "b": params["fc"]["bias"].reshape(1, -1).astype(jnp.float32)}
    return {"layers": layers, "fc": fc}


# ----------------------------------- forward passes ----------------------------------

def bilstm_forward_pallas(x_btd, params, mxu_dtype=jnp.float32, t_chunk=None):
    """x_btd: (B, T, input_size) batch-first, matching the PyTorch module."""
    packed = pack_params_for_pallas(params, mxu_dtype)
    B, T, D = x_btd.shape
    x_flat = jnp.transpose(x_btd, (1, 0, 2)).reshape(T * B, D)   # time-major rows
    num_layers = len(packed["layers"])
    fc_out = None
    for li, lp in enumerate(packed["layers"]):
        is_last = li == num_layers - 1
        fc = (packed["fc"]["w_t"], packed["fc"]["b"]) if is_last else None
        outs = run_bilstm_layer(x_flat, lp, T=T, B=B, fc=fc, t_chunk=t_chunk)
        if is_last:
            _, _, fc_out = outs
        else:
            out_f, out_b = outs
            x_flat = jnp.concatenate([out_f, out_b], axis=-1)    # (T*B, 2H) next-layer input
    return fc_out


def bilstm_forward_ref(x_btd, params):
    """Pure-JAX reference with PyTorch nn.LSTM semantics (gate order [i, f, g, o])."""
    B, T, _ = x_btd.shape
    xs = jnp.transpose(x_btd, (1, 0, 2))                          # (T, B, F)
    for layer in params["layers"]:
        H = layer["fwd"]["w_hh"].shape[1]
        outs_dir = []
        for dname, reverse in (("fwd", False), ("bwd", True)):
            p = layer[dname]
            h = jnp.zeros((B, H), jnp.float32)
            c = jnp.zeros((B, H), jnp.float32)
            outs = [None] * T
            order = range(T - 1, -1, -1) if reverse else range(T)
            for t in order:
                gates = xs[t] @ p["w_ih"].T + h @ p["w_hh"].T + p["b_ih"] + p["b_hh"]
                i_g = jax.nn.sigmoid(gates[:, 0 * H:1 * H])
                f_g = jax.nn.sigmoid(gates[:, 1 * H:2 * H])
                g_g = jnp.tanh(gates[:, 2 * H:3 * H])
                o_g = jax.nn.sigmoid(gates[:, 3 * H:4 * H])
                c = f_g * c + i_g * g_g
                h = o_g * jnp.tanh(c)
                outs[t] = h
            outs_dir.append(jnp.stack(outs, axis=0))
        xs = jnp.concatenate(outs_dir, axis=-1)                   # (T, B, 2H)
    last = xs[-1]                                                 # == out[:, -1, :]
    return last @ params["fc"]["weight"].T + params["fc"]["bias"]


# ------------------------------------------ main -------------------------------------

if __name__ == "__main__":
    BATCH = 2
    SEQ = 8
    INPUT_SIZE = 16
    HIDDEN_SIZE = 32
    NUM_LAYERS = 2
    NUM_CLASSES = 5

    key = jax.random.PRNGKey(0)
    key, xk, pk = jax.random.split(key, 3)
    x = jax.random.normal(xk, (BATCH, SEQ, INPUT_SIZE), jnp.float32)
    params = init_bilstm_params(pk, INPUT_SIZE, HIDDEN_SIZE, NUM_LAYERS, NUM_CLASSES)

    ref = jax.block_until_ready(bilstm_forward_ref(x, params))

    # f32 MXU operands, default (single-chunk) time tiling: tight tolerance.
    out_f32 = jax.block_until_ready(bilstm_forward_pallas(x, params, jnp.float32))
    assert out_f32.shape == (BATCH, NUM_CLASSES), out_f32.shape
    assert jnp.allclose(out_f32, ref, rtol=1e-3, atol=1e-3), (out_f32, ref)

    # Multi-chunk path (t_chunk=4 -> 2 grid steps) exercises carry across time chunks
    # and the cross-grid-step FC stash.
    out_chunked = jax.block_until_ready(
        bilstm_forward_pallas(x, params, jnp.float32, t_chunk=4))
    assert jnp.allclose(out_chunked, ref, rtol=1e-3, atol=1e-3), (out_chunked, ref)

    # bf16 MXU operands: f32 accumulation, f32 carries/gating (looser tolerance).
    out_bf16 = jax.block_until_ready(bilstm_forward_pallas(x, params, jnp.bfloat16))
    assert out_bf16.shape == (BATCH, NUM_CLASSES), out_bf16.shape
    assert bool(jnp.isfinite(out_bf16).all())
    assert jnp.allclose(out_bf16, ref, rtol=5e-2, atol=5e-2), (out_bf16, ref)

    print("KERNEL_OK")
</pallas_src>

<mosaic_0001>
module attributes {stable_mosaic.version = 11 : i64} {
  func.func @_bilstm_layer_kernel(%arg0: i32, %arg1: memref<16x16xf32, #tpu.memory_space<vmem>>, %arg2: memref<16x16xf32, #tpu.memory_space<vmem>>, %arg3: memref<2x16x128xf32, #tpu.memory_space<vmem>>, %arg4: memref<2x1x128xf32, #tpu.memory_space<vmem>>, %arg5: memref<2x32x128xf32, #tpu.memory_space<vmem>>, %arg6: memref<16x32xf32, #tpu.memory_space<vmem>>, %arg7: memref<16x32xf32, #tpu.memory_space<vmem>>, %arg8: memref<2x32xf32, #tpu.memory_space<vmem>>, %arg9: memref<2x32xf32, #tpu.memory_space<vmem>>, %arg10: memref<2x32xf32, #tpu.memory_space<vmem>>, %arg11: memref<2x32xf32, #tpu.memory_space<vmem>>) attributes {dimension_semantics = [#tpu.dimension_semantics<arbitrary>], iteration_bounds = array<i64: 1>, scalar_prefetch = 0 : i64, scratch_operands = 4 : i64, tpu.core_type = #tpu.core_type<tc>, window_params = [{transform_indices = @transform_0, window_bounds = array<i64: 16, 16>}, {transform_indices = @transform_1, window_bounds = array<i64: 16, 16>}, {pipeline_mode = #tpu.pipeline_mode<synchronous>, transform_indices = @transform_2, window_bounds = array<i64: 2, 16, 128>}, {pipeline_mode = #tpu.pipeline_mode<synchronous>, transform_indices = @transform_3, window_bounds = array<i64: 2, 1, 128>}, {pipeline_mode = #tpu.pipeline_mode<synchronous>, transform_indices = @transform_4, window_bounds = array<i64: 2, 32, 128>}, {transform_indices = @transform_5, window_bounds = array<i64: 16, 32>}, {transform_indices = @transform_6, window_bounds = array<i64: 16, 32>}]} {
    %c0_i32 = arith.constant 0 : i32
    %0 = arith.cmpi eq, %arg0, %c0_i32 : i32
    %1 = arith.extui %0 : i1 to i32
    %c0_i32_0 = arith.constant 0 : i32
    %2 = arith.cmpi ne, %1, %c0_i32_0 : i32
    scf.if %2 {
      %cst_95 = arith.constant 0.000000e+00 : f32
      %351 = vector.broadcast %cst_95 : f32 to vector<2x32xf32>
      %c0_96 = arith.constant 0 : index
      %c0_97 = arith.constant 0 : index
      %352 = vector.load %arg8[%c0_96, %c0_97] : memref<2x32xf32, #tpu.memory_space<vmem>>, vector<2x32xf32>
      tpu.vector_store %arg8[%c0_96, %c0_97], %351 {strides = array<i32>} : memref<2x32xf32, #tpu.memory_space<vmem>>, vector<2x32xf32>,
      %cst_98 = arith.constant 0.000000e+00 : f32
      %353 = vector.broadcast %cst_98 : f32 to vector<2x32xf32>
      %c0_99 = arith.constant 0 : index
      %c0_100 = arith.constant 0 : index
      %354 = vector.load %arg9[%c0_99, %c0_100] : memref<2x32xf32, #tpu.memory_space<vmem>>, vector<2x32xf32>
      tpu.vector_store %arg9[%c0_99, %c0_100], %353 {strides = array<i32>} : memref<2x32xf32, #tpu.memory_space<vmem>>, vector<2x32xf32>,
      %cst_101 = arith.constant 0.000000e+00 : f32
      %355 = vector.broadcast %cst_101 : f32 to vector<2x32xf32>
      %c0_102 = arith.constant 0 : index
      %c0_103 = arith.constant 0 : index
      %356 = vector.load %arg10[%c0_102, %c0_103] : memref<2x32xf32, #tpu.memory_space<vmem>>, vector<2x32xf32>
      tpu.vector_store %arg10[%c0_102, %c0_103], %355 {strides = array<i32>} : memref<2x32xf32, #tpu.memory_space<vmem>>, vector<2x32xf32>,
      %cst_104 = arith.constant 0.000000e+00 : f32
      %357 = vector.broadcast %cst_104 : f32 to vector<2x32xf32>
      %c0_105 = arith.constant 0 : index
      %c0_106 = arith.constant 0 : index
      %358 = vector.load %arg11[%c0_105, %c0_106] : memref<2x32xf32, #tpu.memory_space<vmem>>, vector<2x32xf32>
      tpu.vector_store %arg11[%c0_105, %c0_106], %357 {strides = array<i32>} : memref<2x32xf32, #tpu.memory_space<vmem>>, vector<2x32xf32>,
    } else {
    }
    %c0 = arith.constant 0 : index
    %c0_1 = arith.constant 0 : index
    %c0_2 = arith.constant 0 : index
    %3 = vector.load %arg3[%c0, %c0_1, %c0_2] : memref<2x16x128xf32, #tpu.memory_space<vmem>>, vector<1x16x128xf32>
    %4 = vector.shape_cast %3 : vector<1x16x128xf32> to vector<16x128xf32>
    %c1 = arith.constant 1 : index
    %c0_3 = arith.constant 0 : index
    %c0_4 = arith.constant 0 : index
    %5 = vector.load %arg3[%c1, %c0_3, %c0_4] : memref<2x16x128xf32, #tpu.memory_space<vmem>>, vector<1x16x128xf32>
    %6 = vector.shape_cast %5 : vector<1x16x128xf32> to vector<16x128xf32>
    %c0_5 = arith.constant 0 : index
    %c0_6 = arith.constant 0 : index
    %7 = vector.load %arg1[%c0_5, %c0_6] : memref<16x16xf32, #tpu.memory_space<vmem>>, vector<16x16xf32>
    %c0_7 = arith.constant 0 : index
    %c0_8 = arith.constant 0 : index
    %8 = vector.load %arg2[%c0_7, %c0_8] : memref<16x16xf32, #tpu.memory_space<vmem>>, vector<16x16xf32>
    %cst = arith.constant dense<0.000000e+00> : vector<16x128xf32>
    %9 = tpu.matmul %7, %4, %cst {dimension_numbers = #tpu.dot_dimension_numbers<[1], [0], [0], [1], [0, 0, 1, 1], [], []>} : vector<16x16xf32>, vector<16x128xf32>, vector<16x128xf32> -> vector<16x128xf32>
    %c0_9 = arith.constant 0 : index
    %c0_10 = arith.constant 0 : index
    %c0_11 = arith.constant 0 : index
    %10 = vector.load %arg4[%c0_9, %c0_10, %c0_11] : memref<2x1x128xf32, #tpu.memory_space<vmem>>, vector<1x1x128xf32>
    %11 = vector.shape_cast %10 : vector<1x1x128xf32> to vector<1x128xf32>
    %12 = vector.broadcast %11 : vector<1x128xf32> to vector<16x128xf32>
    %13 = arith.addf %9, %12 : vector<16x128xf32>
    %cst_12 = arith.constant dense<0.000000e+00> : vector<16x128xf32>
    %14 = tpu.matmul %8, %6, %cst_12 {dimension_numbers = #tpu.dot_dimension_numbers<[1], [0], [0], [1], [0, 0, 1, 1], [], []>} : vector<16x16xf32>, vector<16x128xf32>, vector<16x128xf32> -> vector<16x128xf32>
    %c1_13 = arith.constant 1 : index
    %c0_14 = arith.constant 0 : index
    %c0_15 = arith.constant 0 : index
    %15 = vector.load %arg4[%c1_13, %c0_14, %c0_15] : memref<2x1x128xf32, #tpu.memory_space<vmem>>, vector<1x1x128xf32>
    %16 = vector.shape_cast %15 : vector<1x1x128xf32> to vector<1x128xf32>
    %17 = vector.broadcast %16 : vector<1x128xf32> to vector<16x128xf32>
    %18 = arith.addf %14, %17 : vector<16x128xf32>
    %c0_16 = arith.constant 0 : index
    %c0_17 = arith.constant 0 : index
    %c0_18 = arith.constant 0 : index
    %19 = vector.load %arg5[%c0_16, %c0_17, %c0_18] : memref<2x32x128xf32, #tpu.memory_space<vmem>>, vector<1x32x128xf32>
    %20 = vector.shape_cast %19 : vector<1x32x128xf32> to vector<32x128xf32>
    %c1_19 = arith.constant 1 : index
    %c0_20 = arith.constant 0 : index
    %c0_21 = arith.constant 0 : index
    %21 = vector.load %arg5[%c1_19, %c0_20, %c0_21] : memref<2x32x128xf32, #tpu.memory_space<vmem>>, vector<1x32x128xf32>
    %22 = vector.shape_cast %21 : vector<1x32x128xf32> to vector<32x128xf32>
    %c0_22 = arith.constant 0 : index
    %c0_23 = arith.constant 0 : index
    %23 = vector.load %arg8[%c0_22, %c0_23] : memref<2x32xf32, #tpu.memory_space<vmem>>, vector<2x32xf32>
    %c0_24 = arith.constant 0 : index
    %c0_25 = arith.constant 0 : index
    %24 = vector.load %arg9[%c0_24, %c0_25] : memref<2x32xf32, #tpu.memory_space<vmem>>, vector<2x32xf32>
    %c0_26 = arith.constant 0 : index
    %c0_27 = arith.constant 0 : index
    %25 = vector.load %arg10[%c0_26, %c0_27] : memref<2x32xf32, #tpu.memory_space<vmem>>, vector<2x32xf32>
    %c0_28 = arith.constant 0 : index
    %c0_29 = arith.constant 0 : index
    %26 = vector.load %arg11[%c0_28, %c0_29] : memref<2x32xf32, #tpu.memory_space<vmem>>, vector<2x32xf32>
    %27 = vector.extract_strided_slice %13 {offsets = [0, 0], sizes = [2, 128], strides = [1, 1]} : vector<16x128xf32> to vector<2x128xf32>
    %cst_30 = arith.constant dense<0.000000e+00> : vector<2x128xf32>
    %28 = tpu.matmul %23, %20, %cst_30 {dimension_numbers = #tpu.dot_dimension_numbers<[1], [0], [0], [1], [0, 0, 1, 1], [], []>} : vector<2x32xf32>, vector<32x128xf32>, vector<2x128xf32> -> vector<2x128xf32>
    %29 = arith.addf %27, %28 : vector<2x128xf32>
    %30 = vector.extract_strided_slice %18 {offsets = [14, 0], sizes = [2, 128], strides = [1, 1]} : vector<16x128xf32> to vector<2x128xf32>
    %cst_31 = arith.constant dense<0.000000e+00> : vector<2x128xf32>
    %31 = tpu.matmul %24, %22, %cst_31 {dimension_numbers = #tpu.dot_dimension_numbers<[1], [0], [0], [1], [0, 0, 1, 1], [], []>} : vector<2x32xf32>, vector<32x128xf32>, vector<2x128xf32> -> vector<2x128xf32>
    %32 = arith.addf %30, %31 : vector<2x128xf32>
    %33 = vector.extract_strided_slice %29 {offsets = [0, 0], sizes = [2, 96], strides = [1, 1]} : vector<2x128xf32> to vector<2x96xf32>
    %34 = arith.negf %33 : vector<2x96xf32>
    %35 = math.exp %34 : vector<2x96xf32>
    %cst_32 = arith.constant 1.000000e+00 : f32
    %36 = vector.broadcast %cst_32 : f32 to vector<2x96xf32>
    %37 = arith.addf %36, %35 : vector<2x96xf32>
    %38 = arith.divf %36, %37 : vector<2x96xf32>
    %39 = vector.extract_strided_slice %29 {offsets = [0, 96], sizes = [2, 32], strides = [1, 1]} : vector<2x128xf32> to vector<2x32xf32>
    %40 = math.tanh %39 : vector<2x32xf32>
    %41 = vector.extract_strided_slice %32 {offsets = [0, 0], sizes = [2, 96], strides = [1, 1]} : vector<2x128xf32> to vector<2x96xf32>
    %42 = arith.negf %41 : vector<2x96xf32>
    %43 = math.exp %42 : vector<2x96xf32>
    %cst_33 = arith.constant 1.000000e+00 : f32
    %44 = vector.broadcast %cst_33 : f32 to vector<2x96xf32>
    %45 = arith.addf %44, %43 : vector<2x96xf32>
    %46 = arith.divf %44, %45 : vector<2x96xf32>
    %47 = vector.extract_strided_slice %32 {offsets = [0, 96], sizes = [2, 32], strides = [1, 1]} : vector<2x128xf32> to vector<2x32xf32>
    %48 = math.tanh %47 : vector<2x32xf32>
    %49 = vector.extract_strided_slice %38 {offsets = [0, 32], sizes = [2, 32], strides = [1, 1]} : vector<2x96xf32> to vector<2x32xf32>
    %50 = arith.mulf %49, %25 : vector<2x32xf32>
    %51 = vector.extract_strided_slice %38 {offsets = [0, 0], sizes = [2, 32], strides = [1, 1]} : vector<2x96xf32> to vector<2x32xf32>
    %52 = arith.mulf %51, %40 : vector<2x32xf32>
    %53 = arith.addf %50, %52 : vector<2x32xf32>
    %54 = vector.extract_strided_slice %46 {offsets = [0, 32], sizes = [2, 32], strides = [1, 1]} : vector<2x96xf32> to vector<2x32xf32>
    %55 = arith.mulf %54, %26 : vector<2x32xf32>
    %56 = vector.extract_strided_slice %46 {offsets = [0, 0], sizes = [2, 32], strides = [1, 1]} : vector<2x96xf32> to vector<2x32xf32>
    %57 = arith.mulf %56, %48 : vector<2x32xf32>
    %58 = arith.addf %55, %57 : vector<2x32xf32>
    %59 = vector.extract_strided_slice %38 {offsets = [0, 64], sizes = [2, 32], strides = [1, 1]} : vector<2x96xf32> to vector<2x32xf32>
    %60 = math.tanh %53 : vector<2x32xf32>
    %61 = arith.mulf %59, %60 : vector<2x32xf32>
    %62 = vector.extract_strided_slice %46 {offsets = [0, 64], sizes = [2, 32], strides = [1, 1]} : vector<2x96xf32> to vector<2x32xf32>
    %63 = math.tanh %58 : vector<2x32xf32>
    %64 = arith.mulf %62, %63 : vector<2x32xf32>
    %c0_34 = arith.constant 0 : index
    %c0_35 = arith.constant 0 : index
    %65 = vector.load %arg6[%c0_34, %c0_35] : memref<16x32xf32, #tpu.memory_space<vmem>>, vector<2x32xf32>
    tpu.vector_store %arg6[%c0_34, %c0_35], %61 {strides = array<i32>} : memref<16x32xf32, #tpu.memory_space<vmem>>, vector<2x32xf32>,
    %c14 = arith.constant 14 : index
    %c0_36 = arith.constant 0 : index
    %66 = vector.load %arg7[%c14, %c0_36] : memref<16x32xf32, #tpu.memory_space<vmem>>, vector<2x32xf32>
    tpu.vector_store %arg7[%c14, %c0_36], %64 {strides = array<i32>} : memref<16x32xf32, #tpu.memory_space<vmem>>, vector<2x32xf32>,
    %67 = vector.extract_strided_slice %13 {offsets = [2, 0], sizes = [2, 128], strides = [1, 1]} : vector<16x128xf32> to vector<2x128xf32>
    %cst_37 = arith.constant dense<0.000000e+00> : vector<2x128xf32>
    %68 = tpu.matmul %61, %20, %cst_37 {dimension_numbers = #tpu.dot_dimension_numbers<[1], [0], [0], [1], [0, 0, 1, 1], [], []>} : vector<2x32xf32>, vector<32x128xf32>, vector<2x128xf32> -> vector<2x128xf32>
    %69 = arith.addf %67, %68 : vector<2x128xf32>
    %70 = vector.extract_strided_slice %18 {offsets = [12, 0], sizes = [2, 128], strides = [1, 1]} : vector<16x128xf32> to vector<2x128xf32>
    %cst_38 = arith.constant dense<0.000000e+00> : vector<2x128xf32>
    %71 = tpu.matmul %64, %22, %cst_38 {dimension_numbers = #tpu.dot_dimension_numbers<[1], [0], [0], [1], [0, 0, 1, 1], [], []>} : vector<2x32xf32>, vector<32x128xf32>, vector<2x128xf32> -> vector<2x128xf32>
    %72 = arith.addf %70, %71 : vector<2x128xf32>
    %73 = vector.extract_strided_slice %69 {offsets = [0, 0], sizes = [2, 96], strides = [1, 1]} : vector<2x128xf32> to vector<2x96xf32>
    %74 = arith.negf %73 : vector<2x96xf32>
    %75 = math.exp %74 : vector<2x96xf32>
    %cst_39 = arith.constant 1.000000e+00 : f32
    %76 = vector.broadcast %cst_39 : f32 to vector<2x96xf32>
    %77 = arith.addf %76, %75 : vector<2x96xf32>
    %78 = arith.divf %76, %77 : vector<2x96xf32>
    %79 = vector.extract_strided_slice %69 {offsets = [0, 96], sizes = [2, 32], strides = [1, 1]} : vector<2x128xf32> to vector<2x32xf32>
    %80 = math.tanh %79 : vector<2x32xf32>
    %81 = vector.extract_strided_slice %72 {offsets = [0, 0], sizes = [2, 96], strides = [1, 1]} : vector<2x128xf32> to vector<2x96xf32>
    %82 = arith.negf %81 : vector<2x96xf32>
    %83 = math.exp %82 : vector<2x96xf32>
    %cst_40 = arith.constant 1.000000e+00 : f32
    %84 = vector.broadcast %cst_40 : f32 to vector<2x96xf32>
    %85 = arith.addf %84, %83 : vector<2x96xf32>
    %86 = arith.divf %84, %85 : vector<2x96xf32>
    %87 = vector.extract_strided_slice %72 {offsets = [0, 96], sizes = [2, 32], strides = [1, 1]} : vector<2x128xf32> to vector<2x32xf32>
    %88 = math.tanh %87 : vector<2x32xf32>
    %89 = vector.extract_strided_slice %78 {offsets = [0, 32], sizes = [2, 32], strides = [1, 1]} : vector<2x96xf32> to vector<2x32xf32>
    %90 = arith.mulf %89, %53 : vector<2x32xf32>
    %91 = vector.extract_strided_slice %78 {offsets = [0, 0], sizes = [2, 32], strides = [1, 1]} : vector<2x96xf32> to vector<2x32xf32>
    %92 = arith.mulf %91, %80 : vector<2x32xf32>
    %93 = arith.addf %90, %92 : vector<2x32xf32>
    %94 = vector.extract_strided_slice %86 {offsets = [0, 32], sizes = [2, 32], strides = [1, 1]} : vector<2x96xf32> to vector<2x32xf32>
    %95 = arith.mulf %94, %58 : vector<2x32xf32>
    %96 = vector.extract_strided_slice %86 {offsets = [0, 0], sizes = [2, 32], strides = [1, 1]} : vector<2x96xf32> to vector<2x32xf32>
    %97 = arith.mulf %96, %88 : vector<2x32xf32>
    %98 = arith.addf %95, %97 : vector<2x32xf32>
    %99 = vector.extract_strided_slice %78 {offsets = [0, 64], sizes = [2, 32], strides = [1, 1]} : vector<2x96xf32> to vector<2x32xf32>
    %100 = math.tanh %93 : vector<2x32xf32>
    %101 = arith.mulf %99, %100 : vector<2x32xf32>
    %102 = vector.extract_strided_slice %86 {offsets = [0, 64], sizes = [2, 32], strides = [1, 1]} : vector<2x96xf32> to vector<2x32xf32>
    %103 = math.tanh %98 : vector<2x32xf32>
    %104 = arith.mulf %102, %103 : vector<2x32xf32>
    %c2 = arith.constant 2 : index
    %c0_41 = arith.constant 0 : index
    %105 = vector.load %arg6[%c2, %c0_41] : memref<16x32xf32, #tpu.memory_space<vmem>>, vector<2x32xf32>
    tpu.vector_store %arg6[%c2, %c0_41], %101 {strides = array<i32>} : memref<16x32xf32, #tpu.memory_space<vmem>>, vector<2x32xf32>,
    %c12 = arith.constant 12 : index
    %c0_42 = arith.constant 0 : index
    %106 = vector.load %arg7[%c12, %c0_42] : memref<16x32xf32, #tpu.memory_space<vmem>>, vector<2x32xf32>
    tpu.vector_store %arg7[%c12, %c0_42], %104 {strides = array<i32>} : memref<16x32xf32, #tpu.memory_space<vmem>>, vector<2x32xf32>,
    %107 = vector.extract_strided_slice %13 {offsets = [4, 0], sizes = [2, 128], strides = [1, 1]} : vector<16x128xf32> to vector<2x128xf32>
    %cst_43 = arith.constant dense<0.000000e+00> : vector<2x128xf32>
    %108 = tpu.matmul %101, %20, %cst_43 {dimension_numbers = #tpu.dot_dimension_numbers<[1], [0], [0], [1], [0, 0, 1, 1], [], []>} : vector<2x32xf32>, vector<32x128xf32>, vector<2x128xf32> -> vector<2x128xf32>
    %109 = arith.addf %107, %108 : vector<2x128xf32>
    %110 = vector.extract_strided_slice %18 {offsets = [10, 0], sizes = [2, 128], strides = [1, 1]} : vector<16x128xf32> to vector<2x128xf32>
    %cst_44 = arith.constant dense<0.000000e+00> : vector<2x128xf32>
    %111 = tpu.matmul %104, %22, %cst_44 {dimension_numbers = #tpu.dot_dimension_numbers<[1], [0], [0], [1], [0, 0, 1, 1], [], []>} : vector<2x32xf32>, vector<32x128xf32>, vector<2x128xf32> -> vector<2x128xf32>
    %112 = arith.addf %110, %111 : vector<2x128xf32>
    %113 = vector.extract_strided_slice %109 {offsets = [0, 0], sizes = [2, 96], strides = [1, 1]} : vector<2x128xf32> to vector<2x96xf32>
    %114 = arith.negf %113 : vector<2x96xf32>
    %115 = math.exp %114 : vector<2x96xf32>
    %cst_45 = arith.constant 1.000000e+00 : f32
    %116 = vector.broadcast %cst_45 : f32 to vector<2x96xf32>
    %117 = arith.addf %116, %115 : vector<2x96xf32>
    %118 = arith.divf %116, %117 : vector<2x96xf32>
    %119 = vector.extract_strided_slice %109 {offsets = [0, 96], sizes = [2, 32], strides = [1, 1]} : vector<2x128xf32> to vector<2x32xf32>
    %120 = math.tanh %119 : vector<2x32xf32>
    %121 = vector.extract_strided_slice %112 {offsets = [0, 0], sizes = [2, 96], strides = [1, 1]} : vector<2x128xf32> to vector<2x96xf32>
    %122 = arith.negf %121 : vector<2x96xf32>
    %123 = math.exp %122 : vector<2x96xf32>
    %cst_46 = arith.constant 1.000000e+00 : f32
    %124 = vector.broadcast %cst_46 : f32 to vector<2x96xf32>
    %125 = arith.addf %124, %123 : vector<2x96xf32>
    %126 = arith.divf %124, %125 : vector<2x96xf32>
    %127 = vector.extract_strided_slice %112 {offsets = [0, 96], sizes = [2, 32], strides = [1, 1]} : vector<2x128xf32> to vector<2x32xf32>
    %128 = math.tanh %127 : vector<2x32xf32>
    %129 = vector.extract_strided_slice %118 {offsets = [0, 32], sizes = [2, 32], strides = [1, 1]} : vector<2x96xf32> to vector<2x32xf32>
    %130 = arith.mulf %129, %93 : vector<2x32xf32>
    %131 = vector.extract_strided_slice %118 {offsets = [0, 0], sizes = [2, 32], strides = [1, 1]} : vector<2x96xf32> to vector<2x32xf32>
    %132 = arith.mulf %131, %120 : vector<2x32xf32>
    %133 = arith.addf %130, %132 : vector<2x32xf32>
    %134 = vector.extract_strided_slice %126 {offsets = [0, 32], sizes = [2, 32], strides = [1, 1]} : vector<2x96xf32> to vector<2x32xf32>
    %135 = arith.mulf %134, %98 : vector<2x32xf32>
    %136 = vector.extract_strided_slice %126 {offsets = [0, 0], sizes = [2, 32], strides = [1, 1]} : vector<2x96xf32> to vector<2x32xf32>
    %137 = arith.mulf %136, %128 : vector<2x32xf32>
    %138 = arith.addf %135, %137 : vector<2x32xf32>
    %139 = vector.extract_strided_slice %118 {offsets = [0, 64], sizes = [2, 32], strides = [1, 1]} : vector<2x96xf32> to vector<2x32xf32>
    %140 = math.tanh %133 : vector<2x32xf32>
    %141 = arith.mulf %139, %140 : vector<2x32xf32>
    %142 = vector.extract_strided_slice %126 {offsets = [0, 64], sizes = [2, 32], strides = [1, 1]} : vector<2x96xf32> to vector<2x32xf32>
    %143 = math.tanh %138 : vector<2x32xf32>
    %144 = arith.mulf %142, %143 : vector<2x32xf32>
    %c4 = arith.constant 4 : index
    %c0_47 = arith.constant 0 : index
    %145 = vector.load %arg6[%c4, %c0_47] : memref<16x32xf32, #tpu.memory_space<vmem>>, vector<2x32xf32>
    tpu.vector_store %arg6[%c4, %c0_47], %141 {strides = array<i32>} : memref<16x32xf32, #tpu.memory_space<vmem>>, vector<2x32xf32>,
    %c10 = arith.constant 10 : index
    %c0_48 = arith.constant 0 : index
    %146 = vector.load %arg7[%c10, %c0_48] : memref<16x32xf32, #tpu.memory_space<vmem>>, vector<2x32xf32>
    tpu.vector_store %arg7[%c10, %c0_48], %144 {strides = array<i32>} : memref<16x32xf32, #tpu.memory_space<vmem>>, vector<2x32xf32>,
    %147 = vector.extract_strided_slice %13 {offsets = [6, 0], sizes = [2, 128], strides = [1, 1]} : vector<16x128xf32> to vector<2x128xf32>
    %cst_49 = arith.constant dense<0.000000e+00> : vector<2x128xf32>
    %148 = tpu.matmul %141, %20, %cst_49 {dimension_numbers = #tpu.dot_dimension_numbers<[1], [0], [0], [1], [0, 0, 1, 1], [], []>} : vector<2x32xf32>, vector<32x128xf32>, vector<2x128xf32> -> vector<2x128xf32>
    %149 = arith.addf %147, %148 : vector<2x128xf32>
    %150 = vector.extract_strided_slice %18 {offsets = [8, 0], sizes = [2, 128], strides = [1, 1]} : vector<16x128xf32> to vector<2x128xf32>
    %cst_50 = arith.constant dense<0.000000e+00> : vector<2x128xf32>
    %151 = tpu.matmul %144, %22, %cst_50 {dimension_numbers = #tpu.dot_dimension_numbers<[1], [0], [0], [1], [0, 0, 1, 1], [], []>} : vector<2x32xf32>, vector<32x128xf32>, vector<2x128xf32> -> vector<2x128xf32>
    %152 = arith.addf %150, %151 : vector<2x128xf32>
    %153 = vector.extract_strided_slice %149 {offsets = [0, 0], sizes = [2, 96], strides = [1, 1]} : vector<2x128xf32> to vector<2x96xf32>
    %154 = arith.negf %153 : vector<2x96xf32>
    %155 = math.exp %154 : vector<2x96xf32>
    %cst_51 = arith.constant 1.000000e+00 : f32
    %156 = vector.broadcast %cst_51 : f32 to vector<2x96xf32>
    %157 = arith.addf %156, %155 : vector<2x96xf32>
    %158 = arith.divf %156, %157 : vector<2x96xf32>
    %159 = vector.extract_strided_slice %149 {offsets = [0, 96], sizes = [2, 32], strides = [1, 1]} : vector<2x128xf32> to vector<2x32xf32>
    %160 = math.tanh %159 : vector<2x32xf32>
    %161 = vector.extract_strided_slice %152 {offsets = [0, 0], sizes = [2, 96], strides = [1, 1]} : vector<2x128xf32> to vector<2x96xf32>
    %162 = arith.negf %161 : vector<2x96xf32>
    %163 = math.exp %162 : vector<2x96xf32>
    %cst_52 = arith.constant 1.000000e+00 : f32
    %164 = vector.broadcast %cst_52 : f32 to vector<2x96xf32>
    %165 = arith.addf %164, %163 : vector<2x96xf32>
    %166 = arith.divf %164, %165 : vector<2x96xf32>
    %167 = vector.extract_strided_slice %152 {offsets = [0, 96], sizes = [2, 32], strides = [1, 1]} : vector<2x128xf32> to vector<2x32xf32>
    %168 = math.tanh %167 : vector<2x32xf32>
    %169 = vector.extract_strided_slice %158 {offsets = [0, 32], sizes = [2, 32], strides = [1, 1]} : vector<2x96xf32> to vector<2x32xf32>
    %170 = arith.mulf %169, %133 : vector<2x32xf32>
    %171 = vector.extract_strided_slice %158 {offsets = [0, 0], sizes = [2, 32], strides = [1, 1]} : vector<2x96xf32> to vector<2x32xf32>
    %172 = arith.mulf %171, %160 : vector<2x32xf32>
    %173 = arith.addf %170, %172 : vector<2x32xf32>
    %174 = vector.extract_strided_slice %166 {offsets = [0, 32], sizes = [2, 32], strides = [1, 1]} : vector<2x96xf32> to vector<2x32xf32>
    %175 = arith.mulf %174, %138 : vector<2x32xf32>
    %176 = vector.extract_strided_slice %166 {offsets = [0, 0], sizes = [2, 32], strides = [1, 1]} : vector<2x96xf32> to vector<2x32xf32>
    %177 = arith.mulf %176, %168 : vector<2x32xf32>
    %178 = arith.addf %175, %177 : vector<2x32xf32>
    %179 = vector.extract_strided_slice %158 {offsets = [0, 64], sizes = [2, 32], strides = [1, 1]} : vector<2x96xf32> to vector<2x32xf32>
    %180 = math.tanh %173 : vector<2x32xf32>
    %181 = arith.mulf %179, %180 : vector<2x32xf32>
    %182 = vector.extract_strided_slice %166 {offsets = [0, 64], sizes = [2, 32], strides = [1, 1]} : vector<2x96xf32> to vector<2x32xf32>
    %183 = math.tanh %178 : vector<2x32xf32>
    %184 = arith.mulf %182, %183 : vector<2x32xf32>
    %c6 = arith.constant 6 : index
    %c0_53 = arith.constant 0 : index
    %185 = vector.load %arg6[%c6, %c0_53] : memref<16x32xf32, #tpu.memory_space<vmem>>, vector<2x32xf32>
    tpu.vector_store %arg6[%c6, %c0_53], %181 {strides = array<i32>} : memref<16x32xf32, #tpu.memory_space<vmem>>, vector<2x32xf32>,
    %c8 = arith.constant 8 : index
    %c0_54 = arith.constant 0 : index
    %186 = vector.load %arg7[%c8, %c0_54] : memref<16x32xf32, #tpu.memory_space<vmem>>, vector<2x32xf32>
    tpu.vector_store %arg7[%c8, %c0_54], %184 {strides = array<i32>} : memref<16x32xf32, #tpu.memory_space<vmem>>, vector<2x32xf32>,
    %187 = vector.extract_strided_slice %13 {offsets = [8, 0], sizes = [2, 128], strides = [1, 1]} : vector<16x128xf32> to vector<2x128xf32>
    %cst_55 = arith.constant dense<0.000000e+00> : vector<2x128xf32>
    %188 = tpu.matmul %181, %20, %cst_55 {dimension_numbers = #tpu.dot_dimension_numbers<[1], [0], [0], [1], [0, 0, 1, 1], [], []>} : vector<2x32xf32>, vector<32x128xf32>, vector<2x128xf32> -> vector<2x128xf32>
    %189 = arith.addf %187, %188 : vector<2x128xf32>
    %190 = vector.extract_strided_slice %18 {offsets = [6, 0], sizes = [2, 128], strides = [1, 1]} : vector<16x128xf32> to vector<2x128xf32>
    %cst_56 = arith.constant dense<0.000000e+00> : vector<2x128xf32>
    %191 = tpu.matmul %184, %22, %cst_56 {dimension_numbers = #tpu.dot_dimension_numbers<[1], [0], [0], [1], [0, 0, 1, 1], [], []>} : vector<2x32xf32>, vector<32x128xf32>, vector<2x128xf32> -> vector<2x128xf32>
    %192 = arith.addf %190, %191 : vector<2x128xf32>
    %193 = vector.extract_strided_slice %189 {offsets = [0, 0], sizes = [2, 96], strides = [1, 1]} : vector<2x128xf32> to vector<2x96xf32>
    %194 = arith.negf %193 : vector<2x96xf32>
    %195 = math.exp %194 : vector<2x96xf32>
    %cst_57 = arith.constant 1.000000e+00 : f32
    %196 = vector.broadcast %cst_57 : f32 to vector<2x96xf32>
    %197 = arith.addf %196, %195 : vector<2x96xf32>
    %198 = arith.divf %196, %197 : vector<2x96xf32>
    %199 = vector.extract_strided_slice %189 {offsets = [0, 96], sizes = [2, 32], strides = [1, 1]} : vector<2x128xf32> to vector<2x32xf32>
    %200 = math.tanh %199 : vector<2x32xf32>
    %201 = vector.extract_strided_slice %192 {offsets = [0, 0], sizes = [2, 96], strides = [1, 1]} : vector<2x128xf32> to vector<2x96xf32>
    %202 = arith.negf %201 : vector<2x96xf32>
    %203 = math.exp %202 : vector<2x96xf32>
    %cst_58 = arith.constant 1.000000e+00 : f32
    %204 = vector.broadcast %cst_58 : f32 to vector<2x96xf32>
    %205 = arith.addf %204, %203 : vector<2x96xf32>
    %206 = arith.divf %204, %205 : vector<2x96xf32>
    %207 = vector.extract_strided_slice %192 {offsets = [0, 96], sizes = [2, 32], strides = [1, 1]} : vector<2x128xf32> to vector<2x32xf32>
    %208 = math.tanh %207 : vector<2x32xf32>
    %209 = vector.extract_strided_slice %198 {offsets = [0, 32], sizes = [2, 32], strides = [1, 1]} : vector<2x96xf32> to vector<2x32xf32>
    %210 = arith.mulf %209, %173 : vector<2x32xf32>
    %211 = vector.extract_strided_slice %198 {offsets = [0, 0], sizes = [2, 32], strides = [1, 1]} : vector<2x96xf32> to vector<2x32xf32>
    %212 = arith.mulf %211, %200 : vector<2x32xf32>
    %213 = arith.addf %210, %212 : vector<2x32xf32>
    %214 = vector.extract_strided_slice %206 {offsets = [0, 32], sizes = [2, 32], strides = [1, 1]} : vector<2x96xf32> to vector<2x32xf32>
    %215 = arith.mulf %214, %178 : vector<2x32xf32>
    %216 = vector.extract_strided_slice %206 {offsets = [0, 0], sizes = [2, 32], strides = [1, 1]} : vector<2x96xf32> to vector<2x32xf32>
    %217 = arith.mulf %216, %208 : vector<2x32xf32>
    %218 = arith.addf %215, %217 : vector<2x32xf32>
    %219 = vector.extract_strided_slice %198 {offsets = [0, 64], sizes = [2, 32], strides = [1, 1]} : vector<2x96xf32> to vector<2x32xf32>
    %220 = math.tanh %213 : vector<2x32xf32>
    %221 = arith.mulf %219, %220 : vector<2x32xf32>
    %222 = vector.extract_strided_slice %206 {offsets = [0, 64], sizes = [2, 32], strides = [1, 1]} : vector<2x96xf32> to vector<2x32xf32>
    %223 = math.tanh %218 : vector<2x32xf32>
    %224 = arith.mulf %222, %223 : vector<2x32xf32>
    %c8_59 = arith.constant 8 : index
    %c0_60 = arith.constant 0 : index
    %225 = vector.load %arg6[%c8_59, %c0_60] : memref<16x32xf32, #tpu.memory_space<vmem>>, vector<2x32xf32>
    tpu.vector_store %arg6[%c8_59, %c0_60], %221 {strides = array<i32>} : memref<16x32xf32, #tpu.memory_space<vmem>>, vector<2x32xf32>,
    %c6_61 = arith.constant 6 : index
    %c0_62 = arith.constant 0 : index
    %226 = vector.load %arg7[%c6_61, %c0_62] : memref<16x32xf32, #tpu.memory_space<vmem>>, vector<2x32xf32>
    tpu.vector_store %arg7[%c6_61, %c0_62], %224 {strides = array<i32>} : memref<16x32xf32, #tpu.memory_space<vmem>>, vector<2x32xf32>,
    %227 = vector.extract_strided_slice %13 {offsets = [10, 0], sizes = [2, 128], strides = [1, 1]} : vector<16x128xf32> to vector<2x128xf32>
    %cst_63 = arith.constant dense<0.000000e+00> : vector<2x128xf32>
    %228 = tpu.matmul %221, %20, %cst_63 {dimension_numbers = #tpu.dot_dimension_numbers<[1], [0], [0], [1], [0, 0, 1, 1], [], []>} : vector<2x32xf32>, vector<32x128xf32>, vector<2x128xf32> -> vector<2x128xf32>
    %229 = arith.addf %227, %228 : vector<2x128xf32>
    %230 = vector.extract_strided_slice %18 {offsets = [4, 0], sizes = [2, 128], strides = [1, 1]} : vector<16x128xf32> to vector<2x128xf32>
    %cst_64 = arith.constant dense<0.000000e+00> : vector<2x128xf32>
    %231 = tpu.matmul %224, %22, %cst_64 {dimension_numbers = #tpu.dot_dimension_numbers<[1], [0], [0], [1], [0, 0, 1, 1], [], []>} : vector<2x32xf32>, vector<32x128xf32>, vector<2x128xf32> -> vector<2x128xf32>
    %232 = arith.addf %230, %231 : vector<2x128xf32>
    %233 = vector.extract_strided_slice %229 {offsets = [0, 0], sizes = [2, 96], strides = [1, 1]} : vector<2x128xf32> to vector<2x96xf32>
    %234 = arith.negf %233 : vector<2x96xf32>
    %235 = math.exp %234 : vector<2x96xf32>
    %cst_65 = arith.constant 1.000000e+00 : f32
    %236 = vector.broadcast %cst_65 : f32 to vector<2x96xf32>
    %237 = arith.addf %236, %235 : vector<2x96xf32>
    %238 = arith.divf %236, %237 : vector<2x96xf32>
    %239 = vector.extract_strided_slice %229 {offsets = [0, 96], sizes = [2, 32], strides = [1, 1]} : vector<2x128xf32> to vector<2x32xf32>
    %240 = math.tanh %239 : vector<2x32xf32>
    %241 = vector.extract_strided_slice %232 {offsets = [0, 0], sizes = [2, 96], strides = [1, 1]} : vector<2x128xf32> to vector<2x96xf32>
    %242 = arith.negf %241 : vector<2x96xf32>
    %243 = math.exp %242 : vector<2x96xf32>
    %cst_66 = arith.constant 1.000000e+00 : f32
    %244 = vector.broadcast %cst_66 : f32 to vector<2x96xf32>
    %245 = arith.addf %244, %243 : vector<2x96xf32>
    %246 = arith.divf %244, %245 : vector<2x96xf32>
    %247 = vector.extract_strided_slice %232 {offsets = [0, 96], sizes = [2, 32], strides = [1, 1]} : vector<2x128xf32> to vector<2x32xf32>
    %248 = math.tanh %247 : vector<2x32xf32>
    %249 = vector.extract_strided_slice %238 {offsets = [0, 32], sizes = [2, 32], strides = [1, 1]} : vector<2x96xf32> to vector<2x32xf32>
    %250 = arith.mulf %249, %213 : vector<2x32xf32>
    %251 = vector.extract_strided_slice %238 {offsets = [0, 0], sizes = [2, 32], strides = [1, 1]} : vector<2x96xf32> to vector<2x32xf32>
    %252 = arith.mulf %251, %240 : vector<2x32xf32>
    %253 = arith.addf %250, %252 : vector<2x32xf32>
    %254 = vector.extract_strided_slice %246 {offsets = [0, 32], sizes = [2, 32], strides = [1, 1]} : vector<2x96xf32> to vector<2x32xf32>
    %255 = arith.mulf %254, %218 : vector<2x32xf32>
    %256 = vector.extract_strided_slice %246 {offsets = [0, 0], sizes = [2, 32], strides = [1, 1]} : vector<2x96xf32> to vector<2x32xf32>
    %257 = arith.mulf %256, %248 : vector<2x32xf32>
    %258 = arith.addf %255, %257 : vector<2x32xf32>
    %259 = vector.extract_strided_slice %238 {offsets = [0, 64], sizes = [2, 32], strides = [1, 1]} : vector<2x96xf32> to vector<2x32xf32>
    %260 = math.tanh %253 : vector<2x32xf32>
    %261 = arith.mulf %259, %260 : vector<2x32xf32>
    %262 = vector.extract_strided_slice %246 {offsets = [0, 64], sizes = [2, 32], strides = [1, 1]} : vector<2x96xf32> to vector<2x32xf32>
    %263 = math.tanh %258 : vector<2x32xf32>
    %264 = arith.mulf %262, %263 : vector<2x32xf32>
    %c10_67 = arith.constant 10 : index
    %c0_68 = arith.constant 0 : index
    %265 = vector.load %arg6[%c10_67, %c0_68] : memref<16x32xf32, #tpu.memory_space<vmem>>, vector<2x32xf32>
    tpu.vector_store %arg6[%c10_67, %c0_68], %261 {strides = array<i32>} : memref<16x32xf32, #tpu.memory_space<vmem>>, vector<2x32xf32>,
    %c4_69 = arith.constant 4 : index
    %c0_70 = arith.constant 0 : index
    %266 = vector.load %arg7[%c4_69, %c0_70] : memref<16x32xf32, #tpu.memory_space<vmem>>, vector<2x32xf32>
    tpu.vector_store %arg7[%c4_69, %c0_70], %264 {strides = array<i32>} : memref<16x32xf32, #tpu.memory_space<vmem>>, vector<2x32xf32>,
    %267 = vector.extract_strided_slice %13 {offsets = [12, 0], sizes = [2, 128], strides = [1, 1]} : vector<16x128xf32> to vector<2x128xf32>
    %cst_71 = arith.constant dense<0.000000e+00> : vector<2x128xf32>
    %268 = tpu.matmul %261, %20, %cst_71 {dimension_numbers = #tpu.dot_dimension_numbers<[1], [0], [0], [1], [0, 0, 1, 1], [], []>} : vector<2x32xf32>, vector<32x128xf32>, vector<2x128xf32> -> vector<2x128xf32>
    %269 = arith.addf %267, %268 : vector<2x128xf32>
    %270 = vector.extract_strided_slice %18 {offsets = [2, 0], sizes = [2, 128], strides = [1, 1]} : vector<16x128xf32> to vector<2x128xf32>
    %cst_72 = arith.constant dense<0.000000e+00> : vector<2x128xf32>
    %271 = tpu.matmul %264, %22, %cst_72 {dimension_numbers = #tpu.dot_dimension_numbers<[1], [0], [0], [1], [0, 0, 1, 1], [], []>} : vector<2x32xf32>, vector<32x128xf32>, vector<2x128xf32> -> vector<2x128xf32>
    %272 = arith.addf %270, %271 : vector<2x128xf32>
    %273 = vector.extract_strided_slice %269 {offsets = [0, 0], sizes = [2, 96], strides = [1, 1]} : vector<2x128xf32> to vector<2x96xf32>
    %274 = arith.negf %273 : vector<2x96xf32>
    %275 = math.exp %274 : vector<2x96xf32>
    %cst_73 = arith.constant 1.000000e+00 : f32
    %276 = vector.broadcast %cst_73 : f32 to vector<2x96xf32>
    %277 = arith.addf %276, %275 : vector<2x96xf32>
    %278 = arith.divf %276, %277 : vector<2x96xf32>
    %279 = vector.extract_strided_slice %269 {offsets = [0, 96], sizes = [2, 32], strides = [1, 1]} : vector<2x128xf32> to vector<2x32xf32>
    %280 = math.tanh %279 : vector<2x32xf32>
    %281 = vector.extract_strided_slice %272 {offsets = [0, 0], sizes = [2, 96], strides = [1, 1]} : vector<2x128xf32> to vector<2x96xf32>
    %282 = arith.negf %281 : vector<2x96xf32>
    %283 = math.exp %282 : vector<2x96xf32>
    %cst_74 = arith.constant 1.000000e+00 : f32
    %284 = vector.broadcast %cst_74 : f32 to vector<2x96xf32>
    %285 = arith.addf %284, %283 : vector<2x96xf32>
    %286 = arith.divf %284, %285 : vector<2x96xf32>
    %287 = vector.extract_strided_slice %272 {offsets = [0, 96], sizes = [2, 32], strides = [1, 1]} : vector<2x128xf32> to vector<2x32xf32>
    %288 = math.tanh %287 : vector<2x32xf32>
    %289 = vector.extract_strided_slice %278 {offsets = [0, 32], sizes = [2, 32], strides = [1, 1]} : vector<2x96xf32> to vector<2x32xf32>
    %290 = arith.mulf %289, %253 : vector<2x32xf32>
    %291 = vector.extract_strided_slice %278 {offsets = [0, 0], sizes = [2, 32], strides = [1, 1]} : vector<2x96xf32> to vector<2x32xf32>
    %292 = arith.mulf %291, %280 : vector<2x32xf32>
    %293 = arith.addf %290, %292 : vector<2x32xf32>
    %294 = vector.extract_strided_slice %286 {offsets = [0, 32], sizes = [2, 32], strides = [1, 1]} : vector<2x96xf32> to vector<2x32xf32>
    %295 = arith.mulf %294, %258 : vector<2x32xf32>
    %296 = vector.extract_strided_slice %286 {offsets = [0, 0], sizes = [2, 32], strides = [1, 1]} : vector<2x96xf32> to vector<2x32xf32>
    %297 = arith.mulf %296, %288 : vector<2x32xf32>
    %298 = arith.addf %295, %297 : vector<2x32xf32>
    %299 = vector.extract_strided_slice %278 {offsets = [0, 64], sizes = [2, 32], strides = [1, 1]} : vector<2x96xf32> to vector<2x32xf32>
    %300 = math.tanh %293 : vector<2x32xf32>
    %301 = arith.mulf %299, %300 : vector<2x32xf32>
    %302 = vector.extract_strided_slice %286 {offsets = [0, 64], sizes = [2, 32], strides = [1, 1]} : vector<2x96xf32> to vector<2x32xf32>
    %303 = math.tanh %298 : vector<2x32xf32>
    %304 = arith.mulf %302, %303 : vector<2x32xf32>
    %c12_75 = arith.constant 12 : index
    %c0_76 = arith.constant 0 : index
    %305 = vector.load %arg6[%c12_75, %c0_76] : memref<16x32xf32, #tpu.memory_space<vmem>>, vector<2x32xf32>
    tpu.vector_store %arg6[%c12_75, %c0_76], %301 {strides = array<i32>} : memref<16x32xf32, #tpu.memory_space<vmem>>, vector<2x32xf32>,
    %c2_77 = arith.constant 2 : index
    %c0_78 = arith.constant 0 : index
    %306 = vector.load %arg7[%c2_77, %c0_78] : memref<16x32xf32, #tpu.memory_space<vmem>>, vector<2x32xf32>
    tpu.vector_store %arg7[%c2_77, %c0_78], %304 {strides = array<i32>} : memref<16x32xf32, #tpu.memory_space<vmem>>, vector<2x32xf32>,
    %307 = vector.extract_strided_slice %13 {offsets = [14, 0], sizes = [2, 128], strides = [1, 1]} : vector<16x128xf32> to vector<2x128xf32>
    %cst_79 = arith.constant dense<0.000000e+00> : vector<2x128xf32>
    %308 = tpu.matmul %301, %20, %cst_79 {dimension_numbers = #tpu.dot_dimension_numbers<[1], [0], [0], [1], [0, 0, 1, 1], [], []>} : vector<2x32xf32>, vector<32x128xf32>, vector<2x128xf32> -> vector<2x128xf32>
    %309 = arith.addf %307, %308 : vector<2x128xf32>
    %310 = vector.extract_strided_slice %18 {offsets = [0, 0], sizes = [2, 128], strides = [1, 1]} : vector<16x128xf32> to vector<2x128xf32>
    %cst_80 = arith.constant dense<0.000000e+00> : vector<2x128xf32>
    %311 = tpu.matmul %304, %22, %cst_80 {dimension_numbers = #tpu.dot_dimension_numbers<[1], [0], [0], [1], [0, 0, 1, 1], [], []>} : vector<2x32xf32>, vector<32x128xf32>, vector<2x128xf32> -> vector<2x128xf32>
    %312 = arith.addf %310, %311 : vector<2x128xf32>
    %313 = vector.extract_strided_slice %309 {offsets = [0, 0], sizes = [2, 96], strides = [1, 1]} : vector<2x128xf32> to vector<2x96xf32>
    %314 = arith.negf %313 : vector<2x96xf32>
    %315 = math.exp %314 : vector<2x96xf32>
    %cst_81 = arith.constant 1.000000e+00 : f32
    %316 = vector.broadcast %cst_81 : f32 to vector<2x96xf32>
    %317 = arith.addf %316, %315 : vector<2x96xf32>
    %318 = arith.divf %316, %317 : vector<2x96xf32>
    %319 = vector.extract_strided_slice %309 {offsets = [0, 96], sizes = [2, 32], strides = [1, 1]} : vector<2x128xf32> to vector<2x32xf32>
    %320 = math.tanh %319 : vector<2x32xf32>
    %321 = vector.extract_strided_slice %312 {offsets = [0, 0], sizes = [2, 96], strides = [1, 1]} : vector<2x128xf32> to vector<2x96xf32>
    %322 = arith.negf %321 : vector<2x96xf32>
    %323 = math.exp %322 : vector<2x96xf32>
    %cst_82 = arith.constant 1.000000e+00 : f32
    %324 = vector.broadcast %cst_82 : f32 to vector<2x96xf32>
    %325 = arith.addf %324, %323 : vector<2x96xf32>
    %326 = arith.divf %324, %325 : vector<2x96xf32>
    %327 = vector.extract_strided_slice %312 {offsets = [0, 96], sizes = [2, 32], strides = [1, 1]} : vector<2x128xf32> to vector<2x32xf32>
    %328 = math.tanh %327 : vector<2x32xf32>
    %329 = vector.extract_strided_slice %318 {offsets = [0, 32], sizes = [2, 32], strides = [1, 1]} : vector<2x96xf32> to vector<2x32xf32>
    %330 = arith.mulf %329, %293 : vector<2x32xf32>
    %331 = vector.extract_strided_slice %318 {offsets = [0, 0], sizes = [2, 32], strides = [1, 1]} : vector<2x96xf32> to vector<2x32xf32>
    %332 = arith.mulf %331, %320 : vector<2x32xf32>
    %333 = arith.addf %330, %332 : vector<2x32xf32>
    %334 = vector.extract_strided_slice %326 {offsets = [0, 32], sizes = [2, 32], strides = [1, 1]} : vector<2x96xf32> to vector<2x32xf32>
    %335 = arith.mulf %334, %298 : vector<2x32xf32>
    %336 = vector.extract_strided_slice %326 {offsets = [0, 0], sizes = [2, 32], strides = [1, 1]} : vector<2x96xf32> to vector<2x32xf32>
    %337 = arith.mulf %336, %328 : vector<2x32xf32>
    %338 = arith.addf %335, %337 : vector<2x32xf32>
    %339 = vector.extract_strided_slice %318 {offsets = [0, 64], sizes = [2, 32], strides = [1, 1]} : vector<2x96xf32> to vector<2x32xf32>
    %340 = math.tanh %333 : vector<2x32xf32>
    %341 = arith.mulf %339, %340 : vector<2x32xf32>
    %342 = vector.extract_strided_slice %326 {offsets = [0, 64], sizes = [2, 32], strides = [1, 1]} : vector<2x96xf32> to vector<2x32xf32>
    %343 = math.tanh %338 : vector<2x32xf32>
    %344 = arith.mulf %342, %343 : vector<2x32xf32>
    %c14_83 = arith.constant 14 : index
    %c0_84 = arith.constant 0 : index
    %345 = vector.load %arg6[%c14_83, %c0_84] : memref<16x32xf32, #tpu.memory_space<vmem>>, vector<2x32xf32>
    tpu.vector_store %arg6[%c14_83, %c0_84], %341 {strides = array<i32>} : memref<16x32xf32, #tpu.memory_space<vmem>>, vector<2x32xf32>,
    %c0_85 = arith.constant 0 : index
    %c0_86 = arith.constant 0 : index
    %346 = vector.load %arg7[%c0_85, %c0_86] : memref<16x32xf32, #tpu.memory_space<vmem>>, vector<2x32xf32>
    tpu.vector_store %arg7[%c0_85, %c0_86], %344 {strides = array<i32>} : memref<16x32xf32, #tpu.memory_space<vmem>>, vector<2x32xf32>,
    %c0_87 = arith.constant 0 : index
    %c0_88 = arith.constant 0 : index
    %347 = vector.load %arg8[%c0_87, %c0_88] : memref<2x32xf32, #tpu.memory_space<vmem>>, vector<2x32xf32>
    tpu.vector_store %arg8[%c0_87, %c0_88], %341 {strides = array<i32>} : memref<2x32xf32, #tpu.memory_space<vmem>>, vector<2x32xf32>,
    %c0_89 = arith.constant 0 : index
    %c0_90 = arith.constant 0 : index
    %348 = vector.load %arg9[%c0_89, %c0_90] : memref<2x32xf32, #tpu.memory_space<vmem>>, vector<2x32xf32>
    tpu.vector_store %arg9[%c0_89, %c0_90], %344 {strides = array<i32>} : memref<2x32xf32, #tpu.memory_space<vmem>>, vector<2x32xf32>,
    %c0_91 = arith.constant 0 : index
    %c0_92 = arith.constant 0 : index
    %349 = vector.load %arg10[%c0_91, %c0_92] : memref<2x32xf32, #tpu.memory_space<vmem>>, vector<2x32xf32>
    tpu.vector_store %arg10[%c0_91, %c0_92], %333 {strides = array<i32>} : memref<2x32xf32, #tpu.memory_space<vmem>>, vector<2x32xf32>,
    %c0_93 = arith.constant 0 : index
    %c0_94 = arith.constant 0 : index
    %350 = vector.load %arg11[%c0_93, %c0_94] : memref<2x32xf32, #tpu.memory_space<vmem>>, vector<2x32xf32>
    tpu.vector_store %arg11[%c0_93, %c0_94], %338 {strides = array<i32>} : memref<2x32xf32, #tpu.memory_space<vmem>>, vector<2x32xf32>,
    return
  }
  func.func @transform_0(%arg0: i32) -> (i32, i32) {
    %c0_i32 = arith.constant 0 : i32
    %c0_i32_0 = arith.constant 0 : i32
    return %arg0, %c0_i32 : i32, i32
  }
  func.func @transform_1(%arg0: i32) -> (i32, i32) {
    %c0_i32 = arith.constant 0 : i32
    %0 = arith.subi %c0_i32, %arg0 : i32
    %c0_i32_0 = arith.constant 0 : i32
    %c0_i32_1 = arith.constant 0 : i32
    return %0, %c0_i32_0 : i32, i32
  }
  func.func @transform_2(%arg0: i32) -> (i32, i32, i32) {
    %c0_i32 = arith.constant 0 : i32
    %c0_i32_0 = arith.constant 0 : i32
    %c0_i32_1 = arith.constant 0 : i32
    %c0_i32_2 = arith.constant 0 : i32
    return %c0_i32, %c0_i32_0, %c0_i32_1 : i32, i32, i32
  }
  func.func @transform_3(%arg0: i32) -> (i32, i32, i32) {
    %c0_i32 = arith.constant 0 : i32
    %c0_i32_0 = arith.constant 0 : i32
    %c0_i32_1 = arith.constant 0 : i32
    %c0_i32_2 = arith.constant 0 : i32
    return %c0_i32, %c0_i32_0, %c0_i32_1 : i32, i32, i32
  }
  func.func @transform_4(%arg0: i32) -> (i32, i32, i32) {
    %c0_i32 = arith.constant 0 : i32
    %c0_i32_0 = arith.constant 0 : i32
    %c0_i32_1 = arith.constant 0 : i32
    %c0_i32_2 = arith.constant 0 : i32
    return %c0_i32, %c0_i32_0, %c0_i32_1 : i32, i32, i32
  }
  func.func @transform_5(%arg0: i32) -> (i32, i32) {
    %c0_i32 = arith.constant 0 : i32
    %c0_i32_0 = arith.constant 0 : i32
    return %arg0, %c0_i32 : i32, i32
  }
  func.func @transform_6(%arg0: i32) -> (i32, i32) {
    %c0_i32 = arith.constant 0 : i32
    %0 = arith.subi %c0_i32, %arg0 : i32
    %c0_i32_0 = arith.constant 0 : i32
    %c0_i32_1 = arith.constant 0 : i32
    return %0, %c0_i32_0 : i32, i32
  }
}

</mosaic_0001>

<bundles_post_ra>
// kernel: tpu_custom_call.1
= control target key start
LH: loop header
LB: loop body
LE: loop exit
PB: predicated region body
PF: predicated region fallthrough
CT: control target
= control target key end

     0   :  { %12 = vsyncpa [#allocation7], 0  ;;  %s3315_s0 = inlined_call_operand.hbm [shape: f32[16,16], index: 0, kind: input, shape index: {}]   ;;  %s3316_s1 = inlined_call_operand.hbm [shape: f32[16,16], index: 1, kind: input, shape index: {}]   ;;  %s3317_s2 = inlined_call_operand.hbm [shape: f32[2,16,128], index: 2, kind: input, shape index: {}]   ;;  %s3318_s3 = inlined_call_operand.vmem [shape: f32[2,1,128], index: 3, kind: input, shape index: {}]   ;;  %s3319_s4 = inlined_call_operand.hbm [shape: f32[2,32,128], index: 4, kind: input, shape index: {}]   ;;  %s3320_s5 = inlined_call_operand.hbm [shape: f32[16,32], index: 5, kind: output, shape index: {0}]   ;;  %s3321_s6 = inlined_call_operand.hbm [shape: f32[16,32], index: 6, kind: output, shape index: {1}]  }
   0x1   :  { %13 = vsyncpa [#allocation10], 0 }
   0x2   :  { %14 = vsyncpa [#allocation13], 0 }
   0x3   :  { %15 = vsyncpa [#allocation8], 0 }
   0x4   :  { %16 = vsyncpa [#allocation16], 0  ;;  %s2815_s21 = smov [#allocation9]   ;;  %s2816_s23 = smov [#allocation6]  }
   0x5   :  { %s38_s22 = sshll.u32 %s2815_s21, 4  ;;  %s22_s24 = sshll.u32 %s2816_s23, 4  ;;  %s39_s22 = int_to_ptr.vmem [resolvable:$true] %s38_s22  ;;  %s2864_s24 = int_to_ptr.vmem [resolvable:$true] %s22_s24 }
   0x6   :  { %s2673_s27 = scalar_lea.hbm %s3316_s1, 256 }
   0x7   :  { %p2674_p0 = scmp.ne.s32.totalorder %s3316_s1, %s2673_s27  ;;  %p2677_p1 = scmp.lt.u32.totalorder %s2673_s27, %s3316_s1 }
   0x9   :  { %p2679_p2 = pnand %p2677_p1, %p2674_p0 }
   0xb   :  { %2682 = shalt.err (!%p2679_p2)
}
   0xc   :  { %s2683_s8 = scalar_lea.vmem %s39_s22, 256  ;;  %p2688_p4 = scmp.lt.s32.totalorder %s39_s22, %s39_s22 }
   0xd   :  { %p2684_p3 = scmp.ne.s32.totalorder %s39_s22, %s2683_s8  ;;  %p2689_p5 = scmp.lt.s32.totalorder %s2683_s8, %s2683_s8 }
   0xf   :  { %p2690_p6 = por %p2689_p5, %p2688_p4 }
  0x11   :  { %p2691_p7 = pnand %p2690_p6, %p2684_p3 }
  0x13   :  { %2694 = shalt.err (!%p2691_p7)
}
  0x14   :  { %s2817_s9 = smov 128   ;;  %s2818_s10 = smov 8  }
  0x15   :  { %44 = dma.hbm_to_vmem [thread:$0]  %s3316_s1, 256, %s39_s22, [#allocation10], %s2817_s9, %s2817_s9, %s2818_s10  }
  0x16   :  { %s2695_s15 = scalar_lea.hbm %s3315_s0, 256 }
  0x17   :  { %p2696_p8 = scmp.ne.s32.totalorder %s3315_s0, %s2695_s15  ;;  %p2699_p9 = scmp.lt.u32.totalorder %s2695_s15, %s3315_s0 }
  0x19   :  { %p2701_p10 = pnand %p2699_p9, %p2696_p8 }
  0x1b   :  { %2704 = shalt.err (!%p2701_p10)
}
  0x1c   :  { %s2705_s20 = scalar_lea.vmem %s2864_s24, 256  ;;  %p2710_p12 = scmp.lt.s32.totalorder %s2864_s24, %s2864_s24 }
  0x1d   :  { %p2706_p11 = scmp.ne.s32.totalorder %s2864_s24, %s2705_s20  ;;  %p2711_p13 = scmp.lt.s32.totalorder %s2705_s20, %s2705_s20 }
  0x1f   :  { %p2712_p0 = por %p2711_p13, %p2710_p12 }
  0x21   :  { %p2713_p1 = pnand %p2712_p0, %p2706_p11 }
  0x23   :  { %2716 = shalt.err (!%p2713_p1)
}
  0x24   :  { %28 = dma.hbm_to_vmem [thread:$0]  %s3315_s0, 256, %s2864_s24, [#allocation7], %s2817_s9, %s2817_s9, %s2818_s10  }
  0x25   :  { %s2819_s22 = smov [#allocation11]   ;;  %s2820_s25 = smov [#allocation12]  }
  0x26   :  { %s50_s23 = sshll.u32 %s2819_s22, 4  ;;  %s64_s26 = sshll.u32 %s2820_s25, 4  ;;  %s51_s23 = int_to_ptr.vmem [resolvable:$true] %s50_s23  ;;  %s2901_s26 = int_to_ptr.vmem [resolvable:$true] %s64_s26 }
  0x27   :  { %s2717_s29 = scalar_lea.hbm %s3317_s2, 512 }
  0x28   :  { %p2718_p2 = scmp.ne.s32.totalorder %s3317_s2, %s2717_s29  ;;  %p2721_p3 = scmp.lt.u32.totalorder %s2717_s29, %s3317_s2 }
  0x2a   :  { %p2723_p4 = pnand %p2721_p3, %p2718_p2 }
  0x2c   :  { %2726 = shalt.err (!%p2723_p4)
}
  0x2d   :  { %s2727_s0 = scalar_lea.vmem %s51_s23, 512  ;;  %p2732_p6 = scmp.lt.s32.totalorder %s51_s23, %s51_s23 }
  0x2e   :  { %p2728_p5 = scmp.ne.s32.totalorder %s51_s23, %s2727_s0  ;;  %p2733_p7 = scmp.lt.s32.totalorder %s2727_s0, %s2727_s0 }
  0x30   :  { %p2734_p8 = por %p2733_p7, %p2732_p6 }
  0x32   :  { %p2735_p9 = pnand %p2734_p8, %p2728_p5 }
  0x34   :  { %2738 = shalt.err (!%p2735_p9)
}
  0x35   :  { %56 = dma.hbm_to_vmem [thread:$0]  %s3317_s2, 512, %s51_s23, [#allocation10], %s2817_s9, %s2817_s9, %s2818_s10  }
  0x36   :  { %s2739_s15 = scalar_lea.hbm %s3319_s4, 1024 }
  0x37   :  { %p2740_p10 = scmp.ne.s32.totalorder %s3319_s4, %s2739_s15  ;;  %p2743_p11 = scmp.lt.u32.totalorder %s2739_s15, %s3319_s4 }
  0x39   :  { %p2745_p12 = pnand %p2743_p11, %p2740_p10 }
  0x3b   :  { %2748 = shalt.err (!%p2745_p12)
}
  0x3c   :  { %s2749_s20 = scalar_lea.vmem %s2901_s26, 1024  ;;  %p2754_p0 = scmp.lt.s32.totalorder %s2901_s26, %s2901_s26 }
  0x3d   :  { %p2750_p13 = scmp.ne.s32.totalorder %s2901_s26, %s2749_s20  ;;  %p2755_p1 = scmp.lt.s32.totalorder %s2749_s20, %s2749_s20 }
  0x3f   :  { %p2756_p2 = por %p2755_p1, %p2754_p0 }
  0x41   :  { %p2757_p3 = pnand %p2756_p2, %p2750_p13 }
  0x43   :  { %2760 = shalt.err (!%p2757_p3)
}
  0x44   :  { %70 = dma.hbm_to_vmem [thread:$0]  %s3319_s4, 1024, %s2901_s26, [#allocation13], %s2817_s9, %s2817_s9, %s2818_s10  }
  0x45   :  { %2805 = dma.done.wait [#allocation7], 256  }
  0x46   :  { %2806 = vsyncadd [#allocation7], 4294967040 }
  0x47   :  { %2807 = dma.done.wait [#allocation10], 768  }
  0x48   :  { %2808 = vsyncadd [#allocation10], 4294966528 }
  0x49   :  { %2809 = dma.done.wait [#allocation13], 1024  }
  0x4a   :  { %2810 = vsyncadd [#allocation13], 4294966272  ;;  %vm91_vm0 = vcmask 254976   ;;  %v2821_v0 = vmov 0.0   ;;  %vm112_vm1 = vcmask 130048   ;;  %v96_v1 = vld [vmem:[#allocation11] sm:$0xff] }
  0x4b   :  { %92 = vst.msk [vmem:[#allocation2] sm:$0x3] %vm91_vm0, %v2821_v0  ;;  %93 = vst.msk [vmem:[#allocation3] sm:$0x3] %vm91_vm0, %v2821_v0  ;;  %v97_v2 = vld [vmem:[#allocation11 + $0x8] sm:$0xff]  ;;  %v99_v3 = vld [vmem:[#allocation11 + $0x10] sm:$0xff] }
  0x4c   :  { %94 = vst.msk [vmem:[#allocation4] sm:$0x3] %vm91_vm0, %v2821_v0  ;;  %95 = vst.msk [vmem:[#allocation5] sm:$0x3] %vm91_vm0, %v2821_v0  ;;  %v2427_v4 = vpack.c.bf16 %v97_v2, %v96_v1  ;;  %v100_v5 = vld [vmem:[#allocation11 + $0x18] sm:$0xff]  ;;  %v101_v6 = vld [vmem:[#allocation6] sm:$0xff] }
  0x4d   :  { %v2431_v7 = vpack.c.bf16 %v100_v5, %v99_v3  ;;  %2241 = vmatprep.mubr.msk.f32.mxu0 %vm112_vm1, %v101_v6  ;;  %v103_v8 = vld [vmem:[#allocation9] sm:$0xff]  ;;  %v283_v9 = vld [vmem:[#allocation12] sm:$0xff]  ;;  %v284_v10 = vld [vmem:[#allocation12 + $0x8] sm:$0xff]  ;;  %v2822_v16 = vmov 0.0|0.0   ;;  %s2823_s4 = smov 32   ;;  %vm2824_vm2 = vmmov 0  }
  0x4e   :  { %2428 = vmatprep.subr.bf16.mxu0 %v2427_v4  ;;  %2248 = vmatprep.mubr.msk.f32.mxu1 %vm112_vm1, %v103_v8  ;;  %v288_v11 = vld [vmem:[#allocation12 + $0x20] sm:$0xff]  ;;  %v289_v12 = vld [vmem:[#allocation12 + $0x28] sm:$0xff]  ;;  %v104_v14 = vld [vmem:[#allocation9 + $0x8] sm:$0xff]  ;;  %v2948_v15 = vpack.c.bf16 %v284_v10, %v283_v9  ;;  %vm296_vm3 = vcmask 261120   ;;  %vm515_vm4 = vcmask 261126   ;;  %vm730_vm5 = vcmask 257026  }
  0x4f   :  { %2432 = vmatprep.subr.bf16.mxu1 %v2431_v7  ;;  %2430 = vmatpush3.bf16.msra.mxu0 %v2427_v4  ;;  %v102_v13 = vld [vmem:[#allocation6 + $0x8] sm:$0xff]  ;;  %v2951_v17 = vpack.c.bf16 %v289_v12, %v288_v11  ;;  %v285_v18 = vld [vmem:[#allocation12 + $0x10] sm:$0xff]  ;;  %v286_v19 = vld [vmem:[#allocation12 + $0x18] sm:$0xff]  ;;  %vm736_vm6 = vcmask 259076   ;;  %s2826_s26 = smov 96   ;;  %s2827_s27 = smov [#allocation14]  }
  0x50   :  { %2434 = vmatpush3.bf16.msra.mxu1 %v2431_v7  ;;  %2435 = vmatprep.subr.bf16.mxu0 %v2822_v16  ;;  %v290_v20 = vld [vmem:[#allocation12 + $0x30] sm:$0xff]  ;;  %v291_v21 = vld [vmem:[#allocation12 + $0x38] sm:$0xff]  ;;  %v2958_v25 = vpack.c.bf16 %v286_v19, %v285_v18  ;;  %s2072_s28 = sshll.u32 %s2827_s27, 4  ;;  %s2828_s29 = smov [#allocation15]   ;;  %s2073_s28 = int_to_ptr.vmem [resolvable:$true] %s2072_s28 }
  0x51   :  { %2441 = vmatprep.subr.bf16.mxu1 %v2822_v16  ;;  %v2962_v26 = vpack.c.bf16 %v291_v21, %v290_v20  ;;  %v2110_v29 = vld [vmem:[%s3318_s3] ss:$0 sm:$0xff]  ;;  %v2114_v31 = vld [vmem:[%s3318_s3 + $0x1] ss:$0 sm:$0xff]  ;;  %s2825_s3 = smov 64   ;;  %s2088_s30 = sshll.u32 %s2828_s29, 4  ;;  %s2089_s30 = int_to_ptr.vmem [resolvable:$true] %s2088_s30 }
  0x52   :  { %2242 = vmatmul.mubr.msk.f32.vlgmr.msra.gmra.mrb[0].mxu0 %vm112_vm1, %v102_v13  ;;  %v292_v27 = vld [vmem:[#allocation2] sm:$0x3]  ;;  %v293_v28 = vld [vmem:[#allocation3] sm:$0x3]  ;;  %s2761_s7 = scalar_lea.vmem %s2073_s28, 256  ;;  %p2766_p5 = scmp.lt.s32.totalorder %s2073_s28, %s2073_s28 }
  0x53   :  { %v294_v22 = vld [vmem:[#allocation4] sm:$0x3]  ;;  %v295_v23 = vld [vmem:[#allocation5] sm:$0x3]  ;;  %2249 = vmatmul.mubr.msk.f32.vlgmr.msra.gmra.mrb[0].mxu1 %vm112_vm1, %v104_v14  ;;  %2437 = vmatpush3.bf16.msra.mxu0 %v2948_v15  ;;  %p2762_p4 = scmp.ne.s32.totalorder %s2073_s28, %s2761_s7  ;;  %p2767_p6 = scmp.lt.s32.totalorder %s2761_s7, %s2761_s7 }
  0x54   :  { %463 = vrot.lane.b32.xlu1 %v294_v22, %s2823_s4  ;;  %v478_v24 = vrot.slane %v295_v23, 2  ;;  %2443 = vmatpush3.bf16.msra.mxu1 %v2951_v17 }
  0x55   :  { %2438 = vmatprep.subr.bf16.mxu0 %v2822_v16  ;;  %2444 = vmatprep.subr.bf16.mxu1 %v2822_v16  ;;  %p2768_p7 = por %p2767_p6, %p2766_p5 }
  0x56   :  { %2259 = vmatprep.mubr.msk.f32.mxu0 %vm2824_vm2, %v2821_v0  ;;  %2270 = vmatprep.mubr.msk.f32.mxu1 %vm2824_vm2, %v2821_v0 }
  0x57   :  { %2440 = vmatpush3.bf16.msra.mxu0 %v2958_v25  ;;  %p2769_p8 = pnand %p2768_p7, %p2762_p4 }
  0x58   :  { %479 = vrot.lane.b32.xlu1 %v478_v24, %s2823_s4  ;;  %2446 = vmatpush3.bf16.msra.mxu1 %v2962_v26 }
  0x59   :  { %2447 = vmatprep.subr.bf16.mxu0 %v2822_v16  ;;  %2453 = vmatprep.subr.bf16.mxu1 %v2822_v16 }
  0x5a   :  { %2260 = vmatmul.mubr.msk.f32.vlgmr.msra.gmra.mrb[2].mxu0 %vm296_vm3, %v292_v27 }
  0x5b   :  { %2271 = vmatmul.mubr.msk.f32.vlgmr.msra.gmra.mrb[2].mxu1 %vm296_vm3, %v293_v28  ;;  %2449 = vmatpush3.bf16.msra.mxu0 %v2948_v15 }
  0x5c   :  { %2450 = vmatprep.subr.bf16.mxu0 %v2822_v16  ;;  %2281 = vmatprep.mubr.msk.f32.mxu0 %vm2824_vm2, %v2821_v0 }
  0x5d   :  { %2455 = vmatpush3.bf16.msra.mxu1 %v2951_v17  ;;  %2292 = vmatprep.mubr.msk.f32.mxu1 %vm2824_vm2, %v2821_v0 }
  0x5e   :  { %2456 = vmatprep.subr.bf16.mxu1 %v2822_v16 }
  0x5f   :  { %2452 = vmatpush3.bf16.msra.mxu0 %v2958_v25 }
  0x60   :  { %2459 = vmatprep.subr.bf16.mxu0 %v2822_v16 }
  0x61   :  { %2458 = vmatpush3.bf16.msra.mxu1 %v2962_v26 }
  0x62   :  { %2465 = vmatprep.subr.bf16.mxu1 %v2822_v16 }
  0xc6   :  { %v464_v60 = vpop.permute.xlu1 %463 }
  0xca   :  { %v480_v62 = vpop.permute.xlu1 %479 }
 0x125   :  { %v2243_v30 = vpop.f32.mrb[0].mxu0 }
 0x126   :  { %v2994_v32 = vadd.f32 %v2243_v30, %v2110_v29  ;;  %v185_v33 = vpop.f32.mrb[1].mxu0  ;;  %v2250_v34 = vpop.f32.mrb[0].mxu1 }
 0x127   :  { %v274_v35 = vpop.f32.mrb[1].mxu1  ;;  %v2998_v37 = vadd.f32 %v2110_v29, %v185_v33  ;;  %v3001_v42 = vadd.f32 %v2250_v34, %v2114_v31 }
 0x128   :  { %v2996_v36 = vadd.f32 %v2114_v31, %v274_v35 }
 0x12d   :  { %v366_v38 = vpop.f32.mrb[2].mxu0 }
 0x12e   :  { %v370_v39 = vadd.f32 %v366_v38, %v2998_v37  ;;  %v440_v40 = vpop.f32.mrb[2].mxu1  ;;  %v2261_v41 = vpop.f32.mrb[3].mxu0 }
 0x12f   :  { %v445_v43 = vrot.slane %v440_v40, 2  ;;  %v2272_v44 = vpop.f32.mrb[3].mxu1 }
 0x130   :  { %2545 = vtanh.f32 %v370_v39  ;;  %v2119_v48 = vmul.f32 -1.442695, %v370_v39 }
 0x131   :  { %v447_v45 = vadd.f32 %v445_v43, %v3001_v42 }
 0x133   :  { %2547 = vtanh.f32 %v447_v45  ;;  %v2120_v49 = vmul.f32 -1.442695, %v447_v45 }
 0x134   :  { %2549 = vpow2.f32 %v2119_v48 }
 0x135   :  { %2551 = vpow2.f32 %v2120_v49 }
 0x13a   :  { %v2546_v46 = vpop.eup %2545 }
 0x13b   :  { %468 = vrot.lane.b32.xlu0 %v2546_v46, %s2823_s4 }
 0x13d   :  { %v2548_v47 = vpop.eup %2547 }
 0x13e   :  { %v2550_v50 = vpop.eup %2549 }
 0x13f   :  { %484 = vrot.lane.b32.xlu0 %v2548_v47, %s2823_s4  ;;  %v451_v51 = vadd.f32 1.0, %v2550_v50  ;;  %v2552_v52 = vpop.eup %2551 }
 0x140   :  { %v458_v53 = vadd.f32 1.0, %v2552_v52 }
 0x141   :  { %2553 = vrcp.f32 %v451_v51 }
 0x142   :  { %2555 = vrcp.f32 %v458_v53 }
 0x14b   :  { %v2554_v54 = vpop.eup %2553 }
 0x14c   :  { %v2556_v57 = vpop.eup %2555  ;;  %v466_v61 = vmul.f32 %v2554_v54, %v464_v60 }
 0x14d   :  { %v482_v2 = vmul.f32 %v2556_v57, %v480_v62 }
 0x1ad   :  { %v469_v55 = vpop.permute.xlu0 %468 }
 0x1ae   :  { %v471_v56 = vmul.f32 %v2554_v54, %v469_v55 }
 0x1b0   :  { %473 = vrot.lane.b32.xlu0 %v471_v56, %s2823_s4 }
 0x1b1   :  { %v485_v58 = vpop.permute.xlu0 %484 }
 0x1b2   :  { %v487_v59 = vmul.f32 %v2556_v57, %v485_v58 }
 0x1b4   :  { %489 = vrot.lane.b32.xlu1 %v487_v59, %s2823_s4 }
 0x222   :  { %v474_v63 = vpop.permute.xlu0 %473 }
 0x223   :  { %v3008_v1 = vadd.f32 %v474_v63, %v466_v61 }
 0x225   :  { %2557 = vtanh.f32 %v3008_v1  ;;  %v687_v45 = vrot.slane %v3008_v1, 6 }
 0x226   :  { %v490_v3 = vpop.permute.xlu1 %489 }
 0x227   :  { %v3011_v4 = vadd.f32 %v490_v3, %v482_v2 }
 0x229   :  { %2559 = vtanh.f32 %v3011_v4  ;;  %v701_v49 = vrot.slane %v3011_v4, 2 }
 0x22f   :  { %v2558_v5 = vpop.eup %2557 }
 0x230   :  { %495 = vrot.lane.b32.xlu0 %v2558_v5, %s2823_s4 }
 0x233   :  { %v2560_v6 = vpop.eup %2559 }
 0x234   :  { %501 = vrot.lane.b32.xlu1 %v2560_v6, %s2823_s4 }
 0x2a2   :  { %v496_v7 = vpop.permute.xlu0 %495 }
 0x2a3   :  { %v498_v8 = vmul.f32 %v2554_v54, %v496_v7 }
 0x2a5   :  { %506 = vrot.lane.b32.xlu0 %v498_v8, %s2825_s3 }
 0x2a6   :  { %v502_v9 = vpop.permute.xlu1 %501 }
 0x2a7   :  { %v3017_v10 = vmul.f32 %v2556_v57, %v502_v9 }
 0x2a9   :  { %v593_v11 = vrot.slane %v3017_v10, 6 }
 0x2ab   :  { %594 = vrot.lane.b32.xlu1 %v593_v11, %s2825_s3 }
 0x317   :  { %v507_v12 = vpop.permute.xlu0 %506 }
 0x318   :  { %510 = vst.msk [vmem:[#allocation14] sm:$0x3] %vm91_vm0, %v507_v12  ;;  %2282 = vmatmul.mubr.msk.f32.vlgmr.msra.gmra.mrb[4].mxu0 %vm296_vm3, %v507_v12 }
 0x319   :  { %2461 = vmatpush3.bf16.msra.mxu0 %v2948_v15  ;;  %2303 = vmatprep.mubr.msk.f32.mxu0 %vm2824_vm2, %v2821_v0 }
 0x31a   :  { %2462 = vmatprep.subr.bf16.mxu0 %v2822_v16 }
 0x31d   :  { %v595_v13 = vpop.permute.xlu1 %594  ;;  %2464 = vmatpush3.bf16.msra.mxu0 %v2958_v25 }
 0x31e   :  { %2293 = vmatmul.mubr.msk.f32.vlgmr.msra.gmra.mrb[4].mxu1 %vm296_vm3, %v595_v13  ;;  %2471 = vmatprep.subr.bf16.mxu0 %v2822_v16 }
 0x31f   :  { %2467 = vmatpush3.bf16.msra.mxu1 %v2951_v17  ;;  %2314 = vmatprep.mubr.msk.f32.mxu1 %vm2824_vm2, %v2821_v0 }
 0x320   :  { %2468 = vmatprep.subr.bf16.mxu1 %v2822_v16 }
 0x323   :  { %2470 = vmatpush3.bf16.msra.mxu1 %v2962_v26 }
 0x324   :  { %2477 = vmatprep.subr.bf16.mxu1 %v2822_v16 }
 0x3eb   :  { %v585_v14 = vpop.f32.mrb[4].mxu0 }
 0x3ec   :  { %v590_v18 = vrot.slane %v585_v14, 6  ;;  %v2283_v19 = vpop.f32.mrb[5].mxu0 }
 0x3ee   :  { %v592_v20 = vadd.f32 %v590_v18, %v2998_v37 }
 0x3f0   :  { %2561 = vtanh.f32 %v592_v20  ;;  %v2123_v29 = vmul.f32 -1.442695, %v592_v20 }
 0x3f1   :  { %v664_v21 = vpop.f32.mrb[4].mxu1 }
 0x3f2   :  { %v669_v22 = vrot.slane %v664_v21, 4  ;;  %v2294_v23 = vpop.f32.mrb[5].mxu1 }
 0x3f4   :  { %v671_v24 = vadd.f32 %v669_v22, %v3001_v42 }
 0x3f6   :  { %2563 = vtanh.f32 %v671_v24  ;;  %v2124_v30 = vmul.f32 -1.442695, %v671_v24 }
 0x3f7   :  { %2565 = vpow2.f32 %v2123_v29 }
 0x3f8   :  { %2567 = vpow2.f32 %v2124_v30 }
 0x3fa   :  { %v2562_v27 = vpop.eup %2561 }
 0x3fb   :  { %691 = vrot.lane.b32.xlu0 %v2562_v27, %s2823_s4 }
 0x400   :  { %v2564_v28 = vpop.eup %2563 }
 0x401   :  { %705 = vrot.lane.b32.xlu1 %v2564_v28, %s2823_s4  ;;  %v2566_v31 = vpop.eup %2565 }
 0x402   :  { %v675_v33 = vadd.f32 1.0, %v2566_v31  ;;  %v2568_v34 = vpop.eup %2567 }
 0x403   :  { %v682_v35 = vadd.f32 1.0, %v2568_v34 }
 0x404   :  { %2569 = vrcp.f32 %v675_v33 }
 0x405   :  { %2571 = vrcp.f32 %v682_v35 }
 0x40e   :  { %v2570_v38 = vpop.eup %2569 }
 0x40f   :  { %v2572_v41 = vpop.eup %2571  ;;  %v689_v46 = vmul.f32 %v2570_v38, %v687_v45 }
 0x410   :  { %v703_v50 = vmul.f32 %v2572_v41, %v701_v49 }
 0x46d   :  { %v692_v39 = vpop.permute.xlu0 %691 }
 0x46e   :  { %v694_v40 = vmul.f32 %v2570_v38, %v692_v39 }
 0x470   :  { %696 = vrot.lane.b32.xlu0 %v694_v40, %s2823_s4 }
 0x473   :  { %v706_v43 = vpop.permute.xlu1 %705 }
 0x474   :  { %v708_v44 = vmul.f32 %v2572_v41, %v706_v43 }
 0x476   :  { %710 = vrot.lane.b32.xlu1 %v708_v44, %s2823_s4 }
 0x4e2   :  { %v697_v47 = vpop.permute.xlu0 %696 }
 0x4e3   :  { %v3043_v48 = vadd.f32 %v697_v47, %v689_v46 }
 0x4e5   :  { %2573 = vtanh.f32 %v3043_v48  ;;  %v911_v28 = vrot.slane %v3043_v48, 6 }
 0x4e8   :  { %v711_v51 = vpop.permute.xlu1 %710 }
 0x4e9   :  { %v3047_v52 = vadd.f32 %v711_v51, %v703_v50 }
 0x4eb   :  { %2575 = vtanh.f32 %v3047_v52  ;;  %v925_v33 = vrot.slane %v3047_v52, 2 }
 0x4ef   :  { %v2574_v53 = vpop.eup %2573 }
 0x4f0   :  { %716 = vrot.lane.b32.xlu0 %v2574_v53, %s2823_s4 }
 0x4f5   :  { %v2576_v54 = vpop.eup %2575 }
 0x4f6   :  { %722 = vrot.lane.b32.xlu1 %v2576_v54, %s2823_s4 }
 0x562   :  { %v717_v55 = vpop.permute.xlu0 %716 }
 0x563   :  { %v3052_v56 = vmul.f32 %v2570_v38, %v717_v55 }
 0x565   :  { %v738_v57 = vrot.slane %v3052_v56, 2 }
 0x567   :  { %739 = vrot.lane.b32.xlu0 %v738_v57, %s2825_s3 }
 0x568   :  { %v723_v58 = vpop.permute.xlu1 %722 }
 0x569   :  { %v3056_v59 = vmul.f32 %v2572_v41, %v723_v58 }
 0x56b   :  { %v817_v60 = vrot.slane %v3056_v59, 4 }
 0x56d   :  { %818 = vrot.lane.b32.xlu1 %v817_v60, %s2825_s3 }
 0x5d9   :  { %v740_v61 = vpop.permute.xlu0 %739 }
 0x5da   :  { %2304 = vmatmul.mubr.msk.f32.vlgmr.msra.gmra.mrb[6].mxu0 %vm296_vm3, %v740_v61 }
 0x5db   :  { %2473 = vmatpush3.bf16.msra.mxu0 %v2948_v15  ;;  %2325 = vmatprep.mubr.msk.f32.mxu0 %vm2824_vm2, %v2821_v0 }
 0x5dc   :  { %2474 = vmatprep.subr.bf16.mxu0 %v2822_v16 }
 0x5df   :  { %v819_v62 = vpop.permute.xlu1 %818  ;;  %2476 = vmatpush3.bf16.msra.mxu0 %v2958_v25 }
 0x5e0   :  { %2315 = vmatmul.mubr.msk.f32.vlgmr.msra.gmra.mrb[6].mxu1 %vm296_vm3, %v819_v62  ;;  %2483 = vmatprep.subr.bf16.mxu0 %v2822_v16 }
 0x5e1   :  { %2479 = vmatpush3.bf16.msra.mxu1 %v2951_v17  ;;  %2336 = vmatprep.mubr.msk.f32.mxu1 %vm2824_vm2, %v2821_v0 }
 0x5e2   :  { %2480 = vmatprep.subr.bf16.mxu1 %v2822_v16 }
 0x5e5   :  { %2482 = vmatpush3.bf16.msra.mxu1 %v2962_v26 }
 0x5e6   :  { %2489 = vmatprep.subr.bf16.mxu1 %v2822_v16 }
 0x6ad   :  { %v809_v63 = vpop.f32.mrb[6].mxu0 }
 0x6ae   :  { %v814_v1 = vrot.slane %v809_v63, 4  ;;  %v2305_v2 = vpop.f32.mrb[7].mxu0 }
 0x6b0   :  { %v816_v3 = vadd.f32 %v814_v1, %v2998_v37 }
 0x6b2   :  { %2577 = vtanh.f32 %v816_v3  ;;  %v2127_v11 = vmul.f32 -1.442695, %v816_v3 }
 0x6b3   :  { %v888_v4 = vpop.f32.mrb[6].mxu1 }
 0x6b4   :  { %v893_v5 = vrot.slane %v888_v4, 6  ;;  %v2316_v6 = vpop.f32.mrb[7].mxu1 }
 0x6b6   :  { %v895_v7 = vadd.f32 %v893_v5, %v3001_v42 }
 0x6b8   :  { %2579 = vtanh.f32 %v895_v7  ;;  %v2128_v12 = vmul.f32 -1.442695, %v895_v7 }
 0x6b9   :  { %2581 = vpow2.f32 %v2127_v11 }
 0x6ba   :  { %2583 = vpow2.f32 %v2128_v12 }
 0x6bc   :  { %v2578_v8 = vpop.eup %2577 }
 0x6bd   :  { %915 = vrot.lane.b32.xlu0 %v2578_v8, %s2823_s4 }
 0x6c2   :  { %v2580_v9 = vpop.eup %2579 }
 0x6c3   :  { %929 = vrot.lane.b32.xlu1 %v2580_v9, %s2823_s4  ;;  %v2582_v13 = vpop.eup %2581 }
 0x6c4   :  { %v899_v14 = vadd.f32 1.0, %v2582_v13  ;;  %v2584_v18 = vpop.eup %2583 }
 0x6c5   :  { %v906_v19 = vadd.f32 1.0, %v2584_v18 }
 0x6c6   :  { %2585 = vrcp.f32 %v899_v14 }
 0x6c7   :  { %2587 = vrcp.f32 %v906_v19 }
 0x6d0   :  { %v2586_v20 = vpop.eup %2585 }
 0x6d1   :  { %v2588_v23 = vpop.eup %2587  ;;  %v913_v29 = vmul.f32 %v2586_v20, %v911_v28 }
 0x6d2   :  { %v927_v34 = vmul.f32 %v2588_v23, %v925_v33 }
 0x72f   :  { %v916_v21 = vpop.permute.xlu0 %915 }
 0x730   :  { %v918_v22 = vmul.f32 %v2586_v20, %v916_v21 }
 0x732   :  { %920 = vrot.lane.b32.xlu0 %v918_v22, %s2823_s4 }
 0x735   :  { %v930_v24 = vpop.permute.xlu1 %929 }
 0x736   :  { %v932_v27 = vmul.f32 %v2588_v23, %v930_v24 }
 0x738   :  { %934 = vrot.lane.b32.xlu1 %v932_v27, %s2823_s4 }
 0x7a4   :  { %v921_v30 = vpop.permute.xlu0 %920 }
 0x7a5   :  { %v3081_v31 = vadd.f32 %v921_v30, %v913_v29 }
 0x7a7   :  { %2589 = vtanh.f32 %v3081_v31  ;;  %v1130_v8 = vrot.slane %v3081_v31, 6 }
 0x7aa   :  { %v935_v35 = vpop.permute.xlu1 %934 }
 0x7ab   :  { %v3085_v38 = vadd.f32 %v935_v35, %v927_v34 }
 0x7ad   :  { %2591 = vtanh.f32 %v3085_v38  ;;  %v1144_v12 = vrot.slane %v3085_v38, 2 }
 0x7b1   :  { %v2590_v39 = vpop.eup %2589 }
 0x7b2   :  { %940 = vrot.lane.b32.xlu0 %v2590_v39, %s2823_s4 }
 0x7b7   :  { %v2592_v40 = vpop.eup %2591 }
 0x7b8   :  { %946 = vrot.lane.b32.xlu1 %v2592_v40, %s2823_s4 }
 0x824   :  { %v941_v41 = vpop.permute.xlu0 %940 }
 0x825   :  { %v3090_v43 = vmul.f32 %v2586_v20, %v941_v41 }
 0x827   :  { %v960_v44 = vrot.slane %v3090_v43, 4 }
 0x829   :  { %961 = vrot.lane.b32.xlu0 %v960_v44, %s2825_s3 }
 0x82a   :  { %v947_v45 = vpop.permute.xlu1 %946 }
 0x82b   :  { %v3094_v46 = vmul.f32 %v2588_v23, %v947_v45 }
 0x82d   :  { %v1039_v47 = vrot.slane %v3094_v46, 2 }
 0x82f   :  { %1040 = vrot.lane.b32.xlu1 %v1039_v47, %s2825_s3 }
 0x89b   :  { %v962_v48 = vpop.permute.xlu0 %961 }
 0x89c   :  { %2326 = vmatmul.mubr.msk.f32.vlgmr.msra.gmra.mrb[8].mxu0 %vm296_vm3, %v962_v48 }
 0x89d   :  { %2485 = vmatpush3.bf16.msra.mxu0 %v2948_v15  ;;  %2347 = vmatprep.mubr.msk.f32.mxu0 %vm2824_vm2, %v2821_v0 }
 0x89e   :  { %2486 = vmatprep.subr.bf16.mxu0 %v2822_v16 }
 0x8a1   :  { %v1041_v49 = vpop.permute.xlu1 %1040  ;;  %2488 = vmatpush3.bf16.msra.mxu0 %v2958_v25 }
 0x8a2   :  { %2337 = vmatmul.mubr.msk.f32.vlgmr.msra.gmra.mrb[8].mxu1 %vm296_vm3, %v1041_v49  ;;  %2495 = vmatprep.subr.bf16.mxu0 %v2822_v16 }
 0x8a3   :  { %2491 = vmatpush3.bf16.msra.mxu1 %v2951_v17  ;;  %2358 = vmatprep.mubr.msk.f32.mxu1 %vm2824_vm2, %v2821_v0 }
 0x8a4   :  { %2492 = vmatprep.subr.bf16.mxu1 %v2822_v16 }
 0x8a7   :  { %2494 = vmatpush3.bf16.msra.mxu1 %v2962_v26 }
 0x8a8   :  { %2501 = vmatprep.subr.bf16.mxu1 %v2822_v16 }
 0x96f   :  { %v1031_v50 = vpop.f32.mrb[8].mxu0 }
 0x970   :  { %v1036_v51 = vrot.slane %v1031_v50, 2  ;;  %v2327_v52 = vpop.f32.mrb[9].mxu0 }
 0x972   :  { %v1038_v53 = vadd.f32 %v1036_v51, %v2998_v37 }
 0x974   :  { %2593 = vtanh.f32 %v1038_v53  ;;  %v2131_v61 = vmul.f32 -1.442695, %v1038_v53 }
 0x975   :  { %v1110_v54 = vpop.f32.mrb[8].mxu1 }
 0x976   :  { %v1114_v55 = vadd.f32 %v1110_v54, %v3001_v42  ;;  %v2338_v57 = vpop.f32.mrb[9].mxu1 }
 0x978   :  { %2595 = vtanh.f32 %v1114_v55  ;;  %v2132_v62 = vmul.f32 -1.442695, %v1114_v55 }
 0x979   :  { %2597 = vpow2.f32 %v2131_v61 }
 0x97a   :  { %2599 = vpow2.f32 %v2132_v62 }
 0x97e   :  { %v2594_v58 = vpop.eup %2593 }
 0x97f   :  { %1134 = vrot.lane.b32.xlu0 %v2594_v58, %s2823_s4 }
 0x982   :  { %v2596_v60 = vpop.eup %2595 }
 0x983   :  { %1148 = vrot.lane.b32.xlu1 %v2596_v60, %s2823_s4  ;;  %v2598_v63 = vpop.eup %2597 }
 0x984   :  { %v1118_v1 = vadd.f32 1.0, %v2598_v63  ;;  %v2600_v2 = vpop.eup %2599 }
 0x985   :  { %v1125_v37 = vadd.f32 1.0, %v2600_v2 }
 0x986   :  { %2601 = vrcp.f32 %v1118_v1 }
 0x987   :  { %2603 = vrcp.f32 %v1125_v37 }
 0x990   :  { %v2602_v3 = vpop.eup %2601 }
 0x991   :  { %v2604_v5 = vpop.eup %2603  ;;  %v1132_v9 = vmul.f32 %v2602_v3, %v1130_v8 }
 0x992   :  { %v1146_v14 = vmul.f32 %v2604_v5, %v1144_v12 }
 0x9f1   :  { %v1135_v42 = vpop.permute.xlu0 %1134 }
 0x9f2   :  { %v1137_v4 = vmul.f32 %v2602_v3, %v1135_v42 }
 0x9f4   :  { %1139 = vrot.lane.b32.xlu0 %v1137_v4, %s2823_s4 }
 0x9f5   :  { %v1149_v6 = vpop.permute.xlu1 %1148 }
 0x9f6   :  { %v1151_v7 = vmul.f32 %v2604_v5, %v1149_v6 }
 0x9f8   :  { %1153 = vrot.lane.b32.xlu1 %v1151_v7, %s2823_s4 }
 0xa66   :  { %v1140_v11 = vpop.permute.xlu0 %1139 }
 0xa67   :  { %v3120_v13 = vadd.f32 %v1140_v11, %v1132_v9 }
 0xa69   :  { %2605 = vtanh.f32 %v3120_v13  ;;  %v1346_v60 = vrot.slane %v3120_v13, 6 }
 0xa6a   :  { %v1154_v18 = vpop.permute.xlu1 %1153 }
 0xa6b   :  { %v3123_v19 = vadd.f32 %v1154_v18, %v1146_v14 }
 0xa6d   :  { %2607 = vtanh.f32 %v3123_v19  ;;  %v1360_v63 = vrot.slane %v3123_v19, 2 }
 0xa73   :  { %v2606_v20 = vpop.eup %2605 }
 0xa74   :  { %1159 = vrot.lane.b32.xlu0 %v2606_v20, %s2823_s4 }
 0xa77   :  { %v2608_v21 = vpop.eup %2607 }
 0xa78   :  { %1165 = vrot.lane.b32.xlu1 %v2608_v21, %s2823_s4 }
 0xae6   :  { %v1160_v22 = vpop.permute.xlu0 %1159 }
 0xae7   :  { %v3128_v23 = vmul.f32 %v2602_v3, %v1160_v22 }
 0xae9   :  { %v1179_v24 = vrot.slane %v3128_v23, 6 }
 0xaea   :  { %v1166_v27 = vpop.permute.xlu1 %1165 }
 0xaeb   :  { %v1168_v28 = vmul.f32 %v2604_v5, %v1166_v27  ;;  %1180 = vrot.lane.b32.xlu1 %v1179_v24, %s2825_s3 }
 0xaed   :  { %1175 = vrot.lane.b32.xlu0 %v1168_v28, %s2825_s3 }
 0xb5d   :  { %v1181_v29 = vpop.permute.xlu1 %1180 }
 0xb5e   :  { %2348 = vmatmul.mubr.msk.f32.vlgmr.msra.gmra.mrb[10].mxu0 %vm296_vm3, %v1181_v29 }
 0xb5f   :  { %v1176_v30 = vpop.permute.xlu0 %1175  ;;  %2497 = vmatpush3.bf16.msra.mxu0 %v2948_v15  ;;  %2369 = vmatprep.mubr.msk.f32.mxu0 %vm2824_vm2, %v2821_v0 }
 0xb60   :  { %1178 = vst.msk [vmem:[#allocation15 + $0x8] sm:$0x3] %vm91_vm0, %v1176_v30  ;;  %2359 = vmatmul.mubr.msk.f32.vlgmr.msra.gmra.mrb[10].mxu1 %vm296_vm3, %v1176_v30  ;;  %2498 = vmatprep.subr.bf16.mxu0 %v2822_v16 }
 0xb61   :  { %2503 = vmatpush3.bf16.msra.mxu1 %v2951_v17  ;;  %2380 = vmatprep.mubr.msk.f32.mxu1 %vm2824_vm2, %v2821_v0 }
 0xb62   :  { %2504 = vmatprep.subr.bf16.mxu1 %v2822_v16 }
 0xb63   :  { %2500 = vmatpush3.bf16.msra.mxu0 %v2958_v25 }
 0xb64   :  { %2507 = vmatprep.subr.bf16.mxu0 %v2822_v16 }
 0xb65   :  { %2506 = vmatpush3.bf16.msra.mxu1 %v2962_v26 }
 0xb66   :  { %2513 = vmatprep.subr.bf16.mxu1 %v2822_v16 }
 0xc31   :  { %v1250_v31 = vpop.f32.mrb[10].mxu0 }
 0xc32   :  { %v1254_v33 = vadd.f32 %v1250_v31, %v2994_v32  ;;  %v2349_v34 = vpop.f32.mrb[11].mxu0 }
 0xc33   :  { %v1323_v35 = vpop.f32.mrb[10].mxu1 }
 0xc34   :  { %2609 = vtanh.f32 %v1254_v33  ;;  %v1328_v38 = vrot.slane %v1323_v35, 2  ;;  %v2360_v39 = vpop.f32.mrb[11].mxu1  ;;  %v2135_v45 = vmul.f32 -1.442695, %v1254_v33 }
 0xc36   :  { %v1330_v40 = vadd.f32 %v1328_v38, %v2996_v36 }
 0xc38   :  { %2611 = vtanh.f32 %v1330_v40  ;;  %v2136_v47 = vmul.f32 -1.442695, %v1330_v40 }
 0xc39   :  { %2613 = vpow2.f32 %v2135_v45 }
 0xc3a   :  { %2615 = vpow2.f32 %v2136_v47 }
 0xc3e   :  { %v2610_v41 = vpop.eup %2609 }
 0xc3f   :  { %1350 = vrot.lane.b32.xlu0 %v2610_v41, %s2823_s4 }
 0xc42   :  { %v2612_v44 = vpop.eup %2611 }
 0xc43   :  { %1364 = vrot.lane.b32.xlu1 %v2612_v44, %s2823_s4  ;;  %v2614_v48 = vpop.eup %2613 }
 0xc44   :  { %v1334_v49 = vadd.f32 1.0, %v2614_v48  ;;  %v2616_v50 = vpop.eup %2615 }
 0xc45   :  { %v1341_v51 = vadd.f32 1.0, %v2616_v50 }
 0xc46   :  { %2617 = vrcp.f32 %v1334_v49 }
 0xc47   :  { %2619 = vrcp.f32 %v1341_v51 }
 0xc50   :  { %v2618_v52 = vpop.eup %2617 }
 0xc51   :  { %v2620_v55 = vpop.eup %2619  ;;  %v1348_v61 = vmul.f32 %v2618_v52, %v1346_v60 }
 0xc52   :  { %v1362_v2 = vmul.f32 %v2620_v55, %v1360_v63 }
 0xcb1   :  { %v1351_v53 = vpop.permute.xlu0 %1350 }
 0xcb2   :  { %v1353_v54 = vmul.f32 %v2618_v52, %v1351_v53 }
 0xcb4   :  { %1355 = vrot.lane.b32.xlu0 %v1353_v54, %s2823_s4 }
 0xcb5   :  { %v1365_v57 = vpop.permute.xlu1 %1364 }
 0xcb6   :  { %v1367_v58 = vmul.f32 %v2620_v55, %v1365_v57 }
 0xcb8   :  { %1369 = vrot.lane.b32.xlu1 %v1367_v58, %s2823_s4 }
 0xd26   :  { %v1356_v62 = vpop.permute.xlu0 %1355 }
 0xd27   :  { %v3156_v1 = vadd.f32 %v1356_v62, %v1348_v61 }
 0xd29   :  { %2621 = vtanh.f32 %v3156_v1  ;;  %v1565_v47 = vrot.slane %v3156_v1, 6 }
 0xd2a   :  { %v1370_v37 = vpop.permute.xlu1 %1369 }
 0xd2b   :  { %v3159_v3 = vadd.f32 %v1370_v37, %v1362_v2 }
 0xd2d   :  { %2623 = vtanh.f32 %v3159_v3  ;;  %v1579_v51 = vrot.slane %v3159_v3, 2 }
 0xd33   :  { %v2622_v42 = vpop.eup %2621 }
 0xd34   :  { %1375 = vrot.lane.b32.xlu0 %v2622_v42, %s2823_s4 }
 0xd37   :  { %v2624_v4 = vpop.eup %2623 }
 0xd38   :  { %1381 = vrot.lane.b32.xlu1 %v2624_v4, %s2823_s4 }
 0xda6   :  { %v1376_v5 = vpop.permute.xlu0 %1375 }
 0xda7   :  { %v1378_v6 = vmul.f32 %v2618_v52, %v1376_v5 }
 0xda9   :  { %1386 = vrot.lane.b32.xlu0 %v1378_v6, %s2825_s3 }
 0xdaa   :  { %v1382_v7 = vpop.permute.xlu1 %1381 }
 0xdab   :  { %v3165_v8 = vmul.f32 %v2620_v55, %v1382_v7 }
 0xdad   :  { %v1471_v9 = vrot.slane %v3165_v8, 6 }
 0xdaf   :  { %1472 = vrot.lane.b32.xlu1 %v1471_v9, %s2825_s3 }
 0xe1b   :  { %v1387_v11 = vpop.permute.xlu0 %1386 }
 0xe1c   :  { %1389 = vst.msk [vmem:[#allocation14 + $0x8] sm:$0x3] %vm91_vm0, %v1387_v11  ;;  %2370 = vmatmul.mubr.msk.f32.vlgmr.msra.gmra.mrb[12].mxu0 %vm296_vm3, %v1387_v11 }
 0xe1d   :  { %2509 = vmatpush3.bf16.msra.mxu0 %v2948_v15  ;;  %2391 = vmatprep.mubr.msk.f32.mxu0 %vm2824_vm2, %v2821_v0 }
 0xe1e   :  { %2510 = vmatprep.subr.bf16.mxu0 %v2822_v16 }
 0xe21   :  { %v1473_v12 = vpop.permute.xlu1 %1472  ;;  %2512 = vmatpush3.bf16.msra.mxu0 %v2958_v25 }
 0xe22   :  { %2381 = vmatmul.mubr.msk.f32.vlgmr.msra.gmra.mrb[12].mxu1 %vm296_vm3, %v1473_v12  ;;  %2519 = vmatprep.subr.bf16.mxu0 %v2822_v16 }
 0xe23   :  { %2515 = vmatpush3.bf16.msra.mxu1 %v2951_v17  ;;  %2402 = vmatprep.mubr.msk.f32.mxu1 %vm2824_vm2, %v2821_v0 }
 0xe24   :  { %2516 = vmatprep.subr.bf16.mxu1 %v2822_v16 }
 0xe27   :  { %2518 = vmatpush3.bf16.msra.mxu1 %v2962_v26 }
 0xe28   :  { %2525 = vmatprep.subr.bf16.mxu1 %v2822_v16 }
 0xeef   :  { %v1463_v13 = vpop.f32.mrb[12].mxu0 }
 0xef0   :  { %v1468_v14 = vrot.slane %v1463_v13, 6  ;;  %v2371_v18 = vpop.f32.mrb[13].mxu0 }
 0xef2   :  { %v1470_v19 = vadd.f32 %v1468_v14, %v2994_v32 }
 0xef4   :  { %2625 = vtanh.f32 %v1470_v19  ;;  %v2139_v29 = vmul.f32 -1.442695, %v1470_v19 }
 0xef5   :  { %v1542_v20 = vpop.f32.mrb[12].mxu1 }
 0xef6   :  { %v1547_v21 = vrot.slane %v1542_v20, 4  ;;  %v2382_v22 = vpop.f32.mrb[13].mxu1 }
 0xef8   :  { %v1549_v24 = vadd.f32 %v1547_v21, %v2996_v36 }
 0xefa   :  { %2627 = vtanh.f32 %v1549_v24  ;;  %v2140_v30 = vmul.f32 -1.442695, %v1549_v24 }
 0xefb   :  { %2629 = vpow2.f32 %v2139_v29 }
 0xefc   :  { %2631 = vpow2.f32 %v2140_v30 }
 0xefe   :  { %v2626_v27 = vpop.eup %2625 }
 0xeff   :  { %1569 = vrot.lane.b32.xlu0 %v2626_v27, %s2823_s4 }
 0xf04   :  { %v2628_v28 = vpop.eup %2627 }
 0xf05   :  { %1583 = vrot.lane.b32.xlu1 %v2628_v28, %s2823_s4  ;;  %v2630_v31 = vpop.eup %2629 }
 0xf06   :  { %v1553_v33 = vadd.f32 1.0, %v2630_v31  ;;  %v2632_v34 = vpop.eup %2631 }
 0xf07   :  { %v1560_v35 = vadd.f32 1.0, %v2632_v34 }
 0xf08   :  { %2633 = vrcp.f32 %v1553_v33 }
 0xf09   :  { %2635 = vrcp.f32 %v1560_v35 }
 0xf12   :  { %v2634_v38 = vpop.eup %2633 }
 0xf13   :  { %v2636_v41 = vpop.eup %2635  ;;  %v1567_v48 = vmul.f32 %v2634_v38, %v1565_v47 }
 0xf14   :  { %v1581_v52 = vmul.f32 %v2636_v41, %v1579_v51 }
 0xf71   :  { %v1570_v39 = vpop.permute.xlu0 %1569 }
 0xf72   :  { %v1572_v40 = vmul.f32 %v2634_v38, %v1570_v39 }
 0xf74   :  { %1574 = vrot.lane.b32.xlu0 %v1572_v40, %s2823_s4 }
 0xf77   :  { %v1584_v44 = vpop.permute.xlu1 %1583 }
 0xf78   :  { %v1586_v45 = vmul.f32 %v2636_v41, %v1584_v44 }
 0xf7a   :  { %1588 = vrot.lane.b32.xlu1 %v1586_v45, %s2823_s4 }
 0xfe6   :  { %v1575_v49 = vpop.permute.xlu0 %1574 }
 0xfe7   :  { %v3191_v50 = vadd.f32 %v1575_v49, %v1567_v48 }
 0xfe9   :  { %2637 = vtanh.f32 %v3191_v50  ;;  %v1787_v24 = vrot.slane %v3191_v50, 6 }
 0xfec   :  { %v1589_v53 = vpop.permute.xlu1 %1588 }
 0xfed   :  { %v3195_v54 = vadd.f32 %v1589_v53, %v1581_v52 }
 0xfef   :  { %2639 = vtanh.f32 %v3195_v54  ;;  %v1801_v30 = vrot.slane %v3195_v54, 2 }
 0xff3   :  { %v2638_v55 = vpop.eup %2637 }
 0xff4   :  { %1594 = vrot.lane.b32.xlu0 %v2638_v55, %s2823_s4 }
 0xff9   :  { %v2640_v57 = vpop.eup %2639 }
 0xffa   :  { %1600 = vrot.lane.b32.xlu1 %v2640_v57, %s2823_s4 }
0x1066   :  { %v1595_v58 = vpop.permute.xlu0 %1594 }
0x1067   :  { %v3200_v60 = vmul.f32 %v2634_v38, %v1595_v58 }
0x1069   :  { %v1614_v61 = vrot.slane %v3200_v60, 2 }
0x106b   :  { %1615 = vrot.lane.b32.xlu0 %v1614_v61, %s2825_s3 }
0x106c   :  { %v1601_v62 = vpop.permute.xlu1 %1600 }
0x106d   :  { %v3204_v63 = vmul.f32 %v2636_v41, %v1601_v62 }
0x106f   :  { %v1693_v1 = vrot.slane %v3204_v63, 4 }
0x1071   :  { %1694 = vrot.lane.b32.xlu1 %v1693_v1, %s2825_s3 }
0x10dd   :  { %v1616_v2 = vpop.permute.xlu0 %1615 }
0x10de   :  { %2392 = vmatmul.mubr.msk.f32.vlgmr.msra.gmra.mrb[14].mxu0 %vm296_vm3, %v1616_v2 }
0x10df   :  { %2521 = vmatpush3.bf16.msra.mxu0 %v2948_v15  ;;  %2413 = vmatprep.mubr.msk.f32.mxu0 %vm2824_vm2, %v2821_v0 }
0x10e0   :  { %2522 = vmatprep.subr.bf16.mxu0 %v2822_v16 }
0x10e3   :  { %v1695_v37 = vpop.permute.xlu1 %1694  ;;  %2524 = vmatpush3.bf16.msra.mxu0 %v2958_v25 }
0x10e4   :  { %2403 = vmatmul.mubr.msk.f32.vlgmr.msra.gmra.mrb[14].mxu1 %vm296_vm3, %v1695_v37 }
0x10e5   :  { %2527 = vmatpush3.bf16.msra.mxu1 %v2951_v17  ;;  %2424 = vmatprep.mubr.msk.f32.mxu1 %vm2824_vm2, %v2821_v0 }
0x10e6   :  { %2528 = vmatprep.subr.bf16.mxu1 %v2822_v16 }
0x10e9   :  { %2530 = vmatpush3.bf16.msra.mxu1 %v2962_v26 }
0x11b1   :  { %v1685_v15 = vpop.f32.mrb[14].mxu0 }
0x11b2   :  { %v1690_v3 = vrot.slane %v1685_v15, 4  ;;  %v2393_v42 = vpop.f32.mrb[15].mxu0 }
0x11b4   :  { %v1692_v4 = vadd.f32 %v1690_v3, %v2994_v32 }
0x11b6   :  { %2641 = vtanh.f32 %v1692_v4  ;;  %v2143_v16 = vmul.f32 -1.442695, %v1692_v4 }
0x11b7   :  { %v1764_v5 = vpop.f32.mrb[14].mxu1 }
0x11b8   :  { %v1769_v6 = vrot.slane %v1764_v5, 6  ;;  %v2404_v25 = vpop.f32.mrb[15].mxu1 }
0x11ba   :  { %v1771_v7 = vadd.f32 %v1769_v6, %v2996_v36 }
0x11bc   :  { %2643 = vtanh.f32 %v1771_v7  ;;  %v2144_v26 = vmul.f32 -1.442695, %v1771_v7 }
0x11bd   :  { %2645 = vpow2.f32 %v2143_v16 }
0x11be   :  { %2647 = vpow2.f32 %v2144_v26 }
0x11c0   :  { %v2642_v17 = vpop.eup %2641 }
0x11c1   :  { %1791 = vrot.lane.b32.xlu0 %v2642_v17, %s2823_s4 }
0x11c6   :  { %v2644_v0 = vpop.eup %2643 }
0x11c7   :  { %1805 = vrot.lane.b32.xlu1 %v2644_v0, %s2823_s4  ;;  %v2646_v9 = vpop.eup %2645 }
0x11c8   :  { %v1775_v11 = vadd.f32 1.0, %v2646_v9  ;;  %v2648_v12 = vpop.eup %2647 }
0x11c9   :  { %v1782_v13 = vadd.f32 1.0, %v2648_v12 }
0x11ca   :  { %2649 = vrcp.f32 %v1775_v11 }
0x11cb   :  { %2651 = vrcp.f32 %v1782_v13 }
0x11d4   :  { %v2650_v14 = vpop.eup %2649 }
0x11d5   :  { %v2652_v20 = vpop.eup %2651  ;;  %v1789_v27 = vmul.f32 %v2650_v14, %v1787_v24 }
0x11d6   :  { %v1803_v31 = vmul.f32 %v2652_v20, %v1801_v30 }
0x1233   :  { %v1792_v18 = vpop.permute.xlu0 %1791 }
0x1234   :  { %v1794_v19 = vmul.f32 %v2650_v14, %v1792_v18 }
0x1236   :  { %1796 = vrot.lane.b32.xlu0 %v1794_v19, %s2823_s4 }
0x1239   :  { %v1806_v21 = vpop.permute.xlu1 %1805 }
0x123a   :  { %v1808_v22 = vmul.f32 %v2652_v20, %v1806_v21 }
0x123c   :  { %1810 = vrot.lane.b32.xlu1 %v1808_v22, %s2823_s4 }
0x12a8   :  { %v1797_v28 = vpop.permute.xlu0 %1796 }
0x12a9   :  { %v1799_v29 = vadd.f32 %v1797_v28, %v1789_v27 }
0x12ab   :  { %2653 = vtanh.f32 %v1799_v29  ;;  %v2006_v25 = vrot.slane %v1799_v29, 6 }
0x12ae   :  { %v1811_v33 = vpop.permute.xlu1 %1810 }
0x12af   :  { %v1813_v34 = vadd.f32 %v1811_v33, %v1803_v31 }
0x12b1   :  { %2655 = vtanh.f32 %v1813_v34  ;;  %v2020_v0 = vrot.slane %v1813_v34, 2 }
0x12b5   :  { %v2654_v35 = vpop.eup %2653 }
0x12b6   :  { %1816 = vrot.lane.b32.xlu0 %v2654_v35, %s2823_s4 }
0x12bb   :  { %v2656_v38 = vpop.eup %2655 }
0x12bc   :  { %1822 = vrot.lane.b32.xlu1 %v2656_v38, %s2823_s4 }
0x1328   :  { %v1817_v39 = vpop.permute.xlu0 %1816 }
0x1329   :  { %v3230_v40 = vmul.f32 %v2650_v14, %v1817_v39 }
0x132b   :  { %v1836_v41 = vrot.slane %v3230_v40, 4 }
0x132d   :  { %1837 = vrot.lane.b32.xlu0 %v1836_v41, %s2825_s3 }
0x132e   :  { %v1823_v44 = vpop.permute.xlu1 %1822 }
0x132f   :  { %v1825_v45 = vmul.f32 %v2652_v20, %v1823_v44 }
0x1331   :  { %v1915_v47 = vrot.slane %v1825_v45, 2 }
0x1333   :  { %1916 = vrot.lane.b32.xlu1 %v1915_v47, %s2825_s3 }
0x139f   :  { %v1838_v48 = vpop.permute.xlu0 %1837 }
0x13a0   :  { %2414 = vmatmul.mubr.msk.f32.vlgmr.msra.gmra.mrb[16].mxu0 %vm296_vm3, %v1838_v48 }
0x13a5   :  { %v1917_v49 = vpop.permute.xlu1 %1916 }
0x13a6   :  { %2425 = vmatmul.mubr.msk.f32.vlgmr.msra.gmra.mrb[16].mxu1 %vm296_vm3, %v1917_v49 }
0x1473   :  { %v1907_v50 = vpop.f32.mrb[16].mxu0 }
0x1474   :  { %v1912_v51 = vrot.slane %v1907_v50, 2  ;;  %v2415_v52 = vpop.f32.mrb[17].mxu0 }
0x1476   :  { %v1914_v53 = vadd.f32 %v1912_v51, %v2994_v32 }
0x1478   :  { %2657 = vtanh.f32 %v1914_v53  ;;  %v2147_v62 = vmul.f32 -1.442695, %v1914_v53 }
0x1479   :  { %v1986_v54 = vpop.f32.mrb[16].mxu1 }
0x147a   :  { %v1990_v55 = vadd.f32 %v1986_v54, %v2996_v36  ;;  %v2426_v57 = vpop.f32.mrb[17].mxu1 }
0x147c   :  { %2659 = vtanh.f32 %v1990_v55  ;;  %v2148_v1 = vmul.f32 -1.442695, %v1990_v55 }
0x147d   :  { %2661 = vpow2.f32 %v2147_v62 }
0x147e   :  { %2663 = vpow2.f32 %v2148_v1 }
0x1482   :  { %v2658_v58 = vpop.eup %2657 }
0x1483   :  { %2010 = vrot.lane.b32.xlu0 %v2658_v58, %s2823_s4 }
0x1486   :  { %v2660_v61 = vpop.eup %2659 }
0x1487   :  { %2024 = vrot.lane.b32.xlu1 %v2660_v61, %s2823_s4  ;;  %v2662_v2 = vpop.eup %2661 }
0x1488   :  { %v1994_v37 = vadd.f32 1.0, %v2662_v2  ;;  %v2664_v15 = vpop.eup %2663 }
0x1489   :  { %v2001_v32 = vadd.f32 1.0, %v2664_v15 }
0x148a   :  { %2665 = vrcp.f32 %v1994_v37 }
0x148b   :  { %2667 = vrcp.f32 %v2001_v32 }
0x1494   :  { %v2666_v3 = vpop.eup %2665 }
0x1495   :  { %v2668_v4 = vpop.eup %2667  ;;  %v2008_v7 = vmul.f32 %v2666_v3, %v2006_v25 }
0x1496   :  { %v2022_v26 = vmul.f32 %v2668_v4, %v2020_v0 }
0x14f5   :  { %v2011_v36 = vpop.permute.xlu0 %2010 }
0x14f6   :  { %v2013_v42 = vmul.f32 %v2666_v3, %v2011_v36 }
0x14f8   :  { %2015 = vrot.lane.b32.xlu0 %v2013_v42, %s2823_s4 }
0x14f9   :  { %v2025_v5 = vpop.permute.xlu1 %2024 }
0x14fa   :  { %v2027_v6 = vmul.f32 %v2668_v4, %v2025_v5 }
0x14fc   :  { %2029 = vrot.lane.b32.xlu1 %v2027_v6, %s2823_s4 }
0x156a   :  { %v2016_v17 = vpop.permute.xlu0 %2015 }
0x156b   :  { %v2018_v16 = vadd.f32 %v2016_v17, %v2008_v7 }
0x156d   :  { %2669 = vtanh.f32 %v2018_v16 }
0x156e   :  { %v2030_v9 = vpop.permute.xlu1 %2029 }
0x156f   :  { %v2032_v11 = vadd.f32 %v2030_v9, %v2022_v26 }
0x1571   :  { %2671 = vtanh.f32 %v2032_v11 }
0x1577   :  { %v2670_v12 = vpop.eup %2669 }
0x1578   :  { %2035 = vrot.lane.b32.xlu0 %v2670_v12, %s2823_s4 }
0x157b   :  { %v2672_v13 = vpop.eup %2671 }
0x157c   :  { %2041 = vrot.lane.b32.xlu1 %v2672_v13, %s2823_s4  ;;  %512 = vrot.lane.b32.xlu0 %v3017_v10, %s2825_s3 }
0x1580   :  { %727 = vrot.lane.b32.xlu1 %v3052_v56, %s2825_s3  ;;  %733 = vrot.lane.b32.xlu0 %v3056_v59, %s2825_s3 }
0x1584   :  { %951 = vrot.lane.b32.xlu1 %v3090_v43, %s2825_s3  ;;  %956 = vrot.lane.b32.xlu0 %v3094_v46, %s2825_s3 }
0x1588   :  { %1170 = vrot.lane.b32.xlu1 %v3128_v23, %s2825_s3  ;;  %1391 = vrot.lane.b32.xlu0 %v3165_v8, %s2825_s3 }
0x158c   :  { %1605 = vrot.lane.b32.xlu1 %v3200_v60, %s2825_s3  ;;  %1610 = vrot.lane.b32.xlu0 %v3204_v63, %s2825_s3 }
0x1590   :  { %1827 = vrot.lane.b32.xlu1 %v3230_v40, %s2825_s3  ;;  %1832 = vrot.lane.b32.xlu0 %v1825_v45, %s2825_s3 }
0x15ea   :  { %v2036_v10 = vpop.permute.xlu0 %2035 }
0x15eb   :  { %v2038_v56 = vmul.f32 %v2666_v3, %v2036_v10 }
0x15ed   :  { %2046 = vrot.lane.b32.xlu1 %v2038_v56, %s2825_s3 }
0x15ee   :  { %v2042_v59 = vpop.permute.xlu1 %2041  ;;  %v513_v43 = vpop.permute.xlu0 %512 }
0x15ef   :  { %v2044_v46 = vmul.f32 %v2668_v4, %v2042_v59  ;;  %516 = vst.msk [vmem:[#allocation15 + $0x8] sm:$0xc0] %vm515_vm4, %v513_v43 }
0x15f1   :  { %2051 = vrot.lane.b32.xlu0 %v2044_v46, %s2825_s3  ;;  %2058 = vrot.lane.b32.xlu1 %v2018_v16, %s2826_s26 }
0x15f2   :  { %v728_v23 = vpop.permute.xlu1 %727  ;;  %v734_v8 = vpop.permute.xlu0 %733 }
0x15f3   :  { %731 = vst.msk [vmem:[#allocation14] sm:$0xc] %vm730_vm5, %v728_v23 }
0x15f4   :  { %737 = vst.msk [vmem:[#allocation15 + $0x8] sm:$0x30] %vm736_vm6, %v734_v8 }
0x15f5   :  { %2063 = vrot.lane.b32.xlu0 %v2032_v11, %s2826_s26 }
0x15f6   :  { %v952_v60 = vpop.permute.xlu1 %951  ;;  %v957_v63 = vpop.permute.xlu0 %956 }
0x15f7   :  { %954 = vst.msk [vmem:[#allocation14] sm:$0x30] %vm736_vm6, %v952_v60 }
0x15f8   :  { %959 = vst.msk [vmem:[#allocation15 + $0x8] sm:$0xc] %vm730_vm5, %v957_v63 }
0x15fa   :  { %v1171_v14 = vpop.permute.xlu1 %1170  ;;  %v1392_v18 = vpop.permute.xlu0 %1391 }
0x15fb   :  { %1173 = vst.msk [vmem:[#allocation14] sm:$0xc0] %vm515_vm4, %v1171_v14  ;;  %1394 = vst.msk [vmem:[#allocation15] sm:$0xc0] %vm515_vm4, %v1392_v18 }
0x15fe   :  { %v1606_v19 = vpop.permute.xlu1 %1605  ;;  %v1611_v20 = vpop.permute.xlu0 %1610 }
0x15ff   :  { %1608 = vst.msk [vmem:[#allocation14 + $0x8] sm:$0xc] %vm730_vm5, %v1606_v19 }
0x1600   :  { %1613 = vst.msk [vmem:[#allocation15] sm:$0x30] %vm736_vm6, %v1611_v20 }
0x1602   :  { %v1828_v21 = vpop.permute.xlu1 %1827  ;;  %v1833_v22 = vpop.permute.xlu0 %1832 }
0x1603   :  { %1830 = vst.msk [vmem:[#allocation14 + $0x8] sm:$0x30] %vm736_vm6, %v1828_v21 }
0x1604   :  { %1835 = vst.msk [vmem:[#allocation15] sm:$0xc] %vm730_vm5, %v1833_v22 }
0x165f   :  { %v2047_v24 = vpop.permute.xlu1 %2046 }
0x1660   :  { %2049 = vst.msk [vmem:[#allocation14 + $0x8] sm:$0xc0] %vm515_vm4, %v2047_v24  ;;  %2055 = vst.msk [vmem:[#allocation2 - $0x6] sm:$0xc0] %vm515_vm4, %v2047_v24 }
0x1661   :  { %2772 = shalt.err (!%p2769_p8)
}
0x1662   :  { %s2773_s0 = scalar_lea.hbm %s3320_s5, 256 }
0x1663   :  { %p2774_p9 = scmp.ne.s32.totalorder %s3320_s5, %s2773_s0  ;;  %p2777_p10 = scmp.lt.u32.totalorder %s2773_s0, %s3320_s5 }
0x1665   :  { %p2779_p11 = pnand %p2777_p10, %p2774_p9 }
0x1667   :  { %2782 = shalt.err (!%p2779_p11)
}
0x1668   :  { %2078 = dma.vmem_to_hbm [thread:$0]  %s2073_s28, 256, %s3320_s5, [#allocation8], %s2817_s9, %s2817_s9, %s2818_s10   ;;  %v2059_v27 = vpop.permute.xlu1 %2058  ;;  %v2052_v28 = vpop.permute.xlu0 %2051 }
0x1669   :  { %2061 = vst.msk [vmem:[#allocation4 - $0x6] sm:$0xc0] %vm515_vm4, %v2059_v27  ;;  %s2783_s17 = scalar_lea.vmem %s2089_s30, 256  ;;  %p2788_p13 = scmp.lt.s32.totalorder %s2089_s30, %s2089_s30 }
0x166a   :  { %2054 = vst.msk [vmem:[#allocation15] sm:$0x3] %vm91_vm0, %v2052_v28  ;;  %2056 = vst.msk [vmem:[#allocation3] sm:$0x3] %vm91_vm0, %v2052_v28  ;;  %p2784_p12 = scmp.ne.s32.totalorder %s2089_s30, %s2783_s17  ;;  %p2789_p0 = scmp.lt.s32.totalorder %s2783_s17, %s2783_s17 }
0x166c   :  { %p2790_p1 = por %p2789_p0, %p2788_p13 }
0x166e   :  { %p2791_p2 = pnand %p2790_p1, %p2784_p12 }
0x1670   :  { %2794 = shalt.err (!%p2791_p2)
}
0x1671   :  { %s2795_s5 = scalar_lea.hbm %s3321_s6, 256 }
0x1672   :  { %p2796_p3 = scmp.ne.s32.totalorder %s3321_s6, %s2795_s5  ;;  %p2799_p4 = scmp.lt.u32.totalorder %s2795_s5, %s3321_s6 }
0x1674   :  { %p2801_p5 = pnand %p2799_p4, %p2796_p3 }
0x1676   :  { %2804 = shalt.err (!%p2801_p5)
}
0x1677   :  { %2094 = dma.vmem_to_hbm [thread:$0]  %s2089_s30, 256, %s3321_s6, [#allocation16], %s2817_s9, %s2817_s9, %s2818_s10   ;;  %v2064_v29 = vpop.permute.xlu0 %2063 }
0x1678   :  { %2066 = vst.msk [vmem:[#allocation5] sm:$0x3] %vm91_vm0, %v2064_v29 }
0x1679   :  { %2811 = dma.done.wait [#allocation8], 256  }
0x167a   :  { %2812 = vsyncadd [#allocation8], 4294967040 }
0x167b   :  { %2813 = dma.done.wait [#allocation16], 256  }
0x167c   :  { %2814 = vsyncadd [#allocation16], 4294967040 }
0x167d   :  { %2101 = vsyncpa [#allocation7], 1 }
0x167e   :  { %2102 = vsyncpa [#allocation10], 1 }
0x167f   :  { %2103 = vsyncpa [#allocation13], 1 }
0x1680   :  { %2104 = vsyncpa [#allocation8], 1 }
0x1681   :  { %2105 = vsyncpa [#allocation16], 1 }

</bundles_post_ra>
